<compile_context>
chip_gen: v7x
topology: tpu7x:2x2x1
jax: 0.10.0
libtpu: 0.0.40
codegen_flags: <defaults>
</compile_context>

<pallas_src>
import functools

import jax
import jax.numpy as jnp
from jax.experimental import pallas as pl
from jax.experimental.pallas import tpu as pltpu


# ----------------------------------------------------------------------------
# Pallas kernels
# ----------------------------------------------------------------------------
def _entry_kernel(xp_ref, w124_ref, b124_ref, w3_ref, b3_ref,
                  o124_ref, o3_ref, *, H, W):
    # Fused "block entry": reads the (padded) input image once and produces
    #   o124 = x @ [W_b1 | W_b2 | W_b4] + [b_b1 | b_b2 | b_b4]   (branches 1,2,4)
    #   o3   = avgpool3x3(x) @ W_b3 + b_b3                        (branch 3)
    # xp_ref : (1, H+2, W+2, Cin)  zero-padded image
    # w124   : (Cin, c0+c1+c3)     b124: (1, c0+c1+c3)
    # w3     : (Cin, c2)           b3  : (1, c2)
    Cin = xp_ref.shape[-1]
    C124 = w124_ref.shape[-1]
    C3 = w3_ref.shape[-1]

    xp = xp_ref[0]                                    # (H+2, W+2, Cin)
    x = xp[1:H + 1, 1:W + 1, :]                       # unpadded interior
    xm = x.reshape(H * W, Cin)

    # -- branches 1, 2, 4: one fused 1x1 matmul over the concatenated Cout -----
    acc = jnp.dot(xm, w124_ref[...], preferred_element_type=jnp.float32)
    acc = acc + b124_ref[...]
    o124_ref[...] = acc.astype(o124_ref.dtype).reshape(1, H, W, C124)

    # -- branch 3: 3x3 avg-pool (count_include_pad=True -> /9) fused with 1x1 --
    psum = jnp.zeros((H, W, Cin), jnp.float32)
    for kh in range(3):                               # VPU adds, overlap with MXU
        for kw in range(3):
            psum = psum + xp[kh:kh + H, kw:kw + W, :].astype(jnp.float32)
    pooled = (psum * (1.0 / 9.0)).reshape(H * W, Cin)
    o3 = jnp.dot(pooled, w3_ref[...], preferred_element_type=jnp.float32)
    o3 = o3 + b3_ref[...]
    o3_ref[...] = o3.astype(o3_ref.dtype).reshape(1, H, W, C3)


def _conv3x3_kernel(xp_ref, w_ref, b_ref, o_ref, *, H, W):
    # 3x3 'same' conv as a single im2col matmul (K = 9*Cin).
    # xp_ref : (1, H+2, W+2, Cin)  zero-padded input
    # w_ref  : (9*Cin, Cout)       flattened (kh, kw, cin)-major
    # b_ref  : (1, Cout)           o_ref: (1, H, W, Cout)
    Cin = xp_ref.shape[-1]
    Cout = w_ref.shape[-1]
    xp = xp_ref[0]                                    # (H+2, W+2, Cin)
    taps = [xp[kh:kh + H, kw:kw + W, :].reshape(H * W, Cin)
            for kh in range(3) for kw in range(3)]
    patch = jnp.concatenate(taps, axis=-1)            # (H*W, 9*Cin)
    acc = jnp.dot(patch, w_ref[...], preferred_element_type=jnp.float32)
    acc = acc + b_ref[...]
    o_ref[...] = acc.astype(o_ref.dtype).reshape(1, H, W, Cout)


# ----------------------------------------------------------------------------
# Wrappers
# ----------------------------------------------------------------------------
def fused_entry_nhwc(x, w124, b124, w3, b3):
    # x: (N, H, W, Cin); w124: (Cin, c0+c1+c3); w3: (Cin, c2)
    N, H, W, Cin = x.shape
    C124 = w124.shape[1]
    C3 = w3.shape[1]
    xp = jnp.pad(x, ((0, 0), (1, 1), (1, 1), (0, 0)))   # pool halo
    kernel = functools.partial(_entry_kernel, H=H, W=W)
    o124, o3 = pl.pallas_call(
        kernel,
        out_shape=(jax.ShapeDtypeStruct((N, H, W, C124), x.dtype),
                   jax.ShapeDtypeStruct((N, H, W, C3), x.dtype)),
        grid=(N,),
        in_specs=[
            pl.BlockSpec((1, H + 2, W + 2, Cin), lambda n: (n, 0, 0, 0)),
            pl.BlockSpec((Cin, C124), lambda n: (0, 0)),
            pl.BlockSpec((1, C124), lambda n: (0, 0)),
            pl.BlockSpec((Cin, C3), lambda n: (0, 0)),
            pl.BlockSpec((1, C3), lambda n: (0, 0)),
        ],
        out_specs=(
            pl.BlockSpec((1, H, W, C124), lambda n: (n, 0, 0, 0)),
            pl.BlockSpec((1, H, W, C3), lambda n: (n, 0, 0, 0)),
        ),
        compiler_params=pltpu.CompilerParams(dimension_semantics=("parallel",)),
    )(xp, w124, b124.reshape(1, C124), w3, b3.reshape(1, C3))
    return o124, o3


def conv3x3_nhwc(x, w, b):
    # x: (N, H, W, Cin), w: (3, 3, Cin, Cout), b: (Cout,) -- 'same' padding (pad=1)
    N, H, W, Cin = x.shape
    Cout = w.shape[-1]
    xp = jnp.pad(x, ((0, 0), (1, 1), (1, 1), (0, 0)))
    w_flat = w.reshape(9 * Cin, Cout)                  # (kh, kw, cin)-major rows
    kernel = functools.partial(_conv3x3_kernel, H=H, W=W)
    # TODO(synk): for inception-scale H*W on v7x (64 MiB VMEM), add a row-band
    # grid axis with a 1-row halo instead of one full image per step.
    out = pl.pallas_call(
        kernel,
        out_shape=jax.ShapeDtypeStruct((N, H, W, Cout), x.dtype),
        grid=(N,),
        in_specs=[
            pl.BlockSpec((1, H + 2, W + 2, Cin), lambda n: (n, 0, 0, 0)),
            pl.BlockSpec((9 * Cin, Cout), lambda n: (0, 0)),
            pl.BlockSpec((1, Cout), lambda n: (0, 0)),
        ],
        out_specs=pl.BlockSpec((1, H, W, Cout), lambda n: (n, 0, 0, 0)),
        compiler_params=pltpu.CompilerParams(dimension_semantics=("parallel",)),
    )(xp, w_flat, b.reshape(1, Cout))
    return out


# ----------------------------------------------------------------------------
# Inceptionx3 forward
# ----------------------------------------------------------------------------
def init_params(key, in_fts, out_fts):
    ks = jax.random.split(key, 14)
    scale = 0.1

    def w1x1(k, ci, co):
        return scale * jax.random.normal(k, (ci, co), jnp.float32)

    def w3x3(k, ci, co):
        return scale * jax.random.normal(k, (3, 3, ci, co), jnp.float32)

    def bias(k, co):
        return scale * jax.random.normal(k, (co,), jnp.float32)

    c0, c1, c2, c3 = out_fts
    return {
        "b1_w0": w1x1(ks[0], in_fts, c0), "b1_b0": bias(ks[1], c0),
        "b1_w1": w3x3(ks[2], c0, c0),     "b1_b1": bias(ks[3], c0),
        "b1_w2": w3x3(ks[4], c0, c0),     "b1_b2": bias(ks[5], c0),
        "b2_w0": w1x1(ks[6], in_fts, c1), "b2_b0": bias(ks[7], c1),
        "b2_w1": w3x3(ks[8], c1, c1),     "b2_b1": bias(ks[9], c1),
        "b3_w0": w1x1(ks[10], in_fts, c2), "b3_b0": bias(ks[11], c2),
        "b4_w0": w1x1(ks[12], in_fts, c3), "b4_b0": bias(ks[13], c3),
    }


def inceptionx3_forward(x_nchw, p):
    # x_nchw: (N, Cin, H, W) -> (N, sum(out_fts), H, W)
    x = jnp.transpose(x_nchw, (0, 2, 3, 1))            # -> NHWC
    c0 = p["b1_w0"].shape[1]
    c1 = p["b2_w0"].shape[1]

    # Fused entry: one read of x for branches 1, 2, 4 (single wide 1x1 matmul)
    # and branch 3 (avgpool + 1x1) in the same kernel.
    w124 = jnp.concatenate([p["b1_w0"], p["b2_w0"], p["b4_w0"]], axis=1)
    b124 = jnp.concatenate([p["b1_b0"], p["b2_b0"], p["b4_b0"]], axis=0)
    t124, o3 = fused_entry_nhwc(x, w124, b124, p["b3_w0"], p["b3_b0"])

    t1 = t124[..., :c0]                                 # branch1 entry
    t2 = t124[..., c0:c0 + c1]                          # branch2 entry
    o4 = t124[..., c0 + c1:]                            # branch4 (final)

    # branch1: 3x3 -> 3x3 ; branch2: 3x3   (single im2col matmul each)
    o1 = conv3x3_nhwc(t1, p["b1_w1"], p["b1_b1"])
    o1 = conv3x3_nhwc(o1, p["b1_w2"], p["b1_b2"])
    o2 = conv3x3_nhwc(t2, p["b2_w1"], p["b2_b1"])

    out = jnp.concatenate([o1, o2, o3, o4], axis=-1)    # channel concat (dim=1 NCHW)
    return jnp.transpose(out, (0, 3, 1, 2))             # -> NCHW


# ----------------------------------------------------------------------------
# Pure-JAX reference (for correctness check)
# ----------------------------------------------------------------------------
def _ref_conv(x_nchw, w, b, pad):
    # w layouts: 1x1 -> (Cin, Cout); 3x3 -> (3, 3, Cin, Cout)
    if w.ndim == 2:
        w_oihw = jnp.transpose(w, (1, 0))[:, :, None, None]
    else:
        w_oihw = jnp.transpose(w, (3, 2, 0, 1))
    y = jax.lax.conv_general_dilated(
        x_nchw, w_oihw, (1, 1), [(pad, pad), (pad, pad)],
        dimension_numbers=("NCHW", "OIHW", "NCHW"))
    return y + b[None, :, None, None]


def _ref_avgpool(x_nchw):
    xp = jnp.pad(x_nchw, ((0, 0), (0, 0), (1, 1), (1, 1)))
    s = jax.lax.reduce_window(xp, 0.0, jax.lax.add, (1, 1, 3, 3),
                              (1, 1, 1, 1), "VALID")
    return s / 9.0


def inceptionx3_reference(x, p):
    o1 = _ref_conv(x, p["b1_w0"], p["b1_b0"], 0)
    o1 = _ref_conv(o1, p["b1_w1"], p["b1_b1"], 1)
    o1 = _ref_conv(o1, p["b1_w2"], p["b1_b2"], 1)
    o2 = _ref_conv(x, p["b2_w0"], p["b2_b0"], 0)
    o2 = _ref_conv(o2, p["b2_w1"], p["b2_b1"], 1)
    o3 = _ref_conv(_ref_avgpool(x), p["b3_w0"], p["b3_b0"], 0)
    o4 = _ref_conv(x, p["b4_w0"], p["b4_b0"], 0)
    return jnp.concatenate([o1, o2, o3, o4], axis=1)


# ----------------------------------------------------------------------------
if __name__ == "__main__":
    key = jax.random.PRNGKey(0)
    k_x, k_p = jax.random.split(key)

    N, Cin, H, W = 2, 4, 16, 16
    out_fts = (4, 3, 2, 5)

    x = jax.random.normal(k_x, (N, Cin, H, W), jnp.float32)
    params = init_params(k_p, Cin, out_fts)

    out = jax.block_until_ready(inceptionx3_forward(x, params))
    assert out.shape == (N, sum(out_fts), H, W), out.shape

    ref = jax.block_until_ready(inceptionx3_reference(x, params))
    assert jnp.allclose(out, ref, atol=1e-4, rtol=1e-4), \
        float(jnp.max(jnp.abs(out - ref)))

    print("KERNEL_OK")
</pallas_src>

<mosaic_0001>
module attributes {stable_mosaic.version = 11 : i64} {
  func.func @_entry_kernel(%arg0: i32, %arg1: memref<1x18x18x4xf32, #tpu.memory_space<vmem>>, %arg2: memref<4x12xf32, #tpu.memory_space<vmem>>, %arg3: memref<1x12xf32, #tpu.memory_space<vmem>>, %arg4: memref<4x2xf32, #tpu.memory_space<vmem>>, %arg5: memref<1x2xf32, #tpu.memory_space<vmem>>, %arg6: memref<1x16x16x12xf32, #tpu.memory_space<vmem>>, %arg7: memref<1x16x16x2xf32, #tpu.memory_space<vmem>>) attributes {dimension_semantics = [#tpu.dimension_semantics<parallel>], iteration_bounds = array<i64: 2>, scalar_prefetch = 0 : i64, scratch_operands = 0 : i64, tpu.core_type = #tpu.core_type<tc>, window_params = [{transform_indices = @transform_0, window_bounds = array<i64: 1, 18, 18, 4>}, {pipeline_mode = #tpu.pipeline_mode<synchronous>, transform_indices = @transform_1, window_bounds = array<i64: 4, 12>}, {pipeline_mode = #tpu.pipeline_mode<synchronous>, transform_indices = @transform_2, window_bounds = array<i64: 1, 12>}, {pipeline_mode = #tpu.pipeline_mode<synchronous>, transform_indices = @transform_3, window_bounds = array<i64: 4, 2>}, {pipeline_mode = #tpu.pipeline_mode<synchronous>, transform_indices = @transform_4, window_bounds = array<i64: 1, 2>}, {transform_indices = @transform_5, window_bounds = array<i64: 1, 16, 16, 12>}, {transform_indices = @transform_6, window_bounds = array<i64: 1, 16, 16, 2>}]} {
    %c0 = arith.constant 0 : index
    %c0_0 = arith.constant 0 : index
    %c0_1 = arith.constant 0 : index
    %c0_2 = arith.constant 0 : index
    %0 = vector.load %arg1[%c0, %c0_0, %c0_1, %c0_2] : memref<1x18x18x4xf32, #tpu.memory_space<vmem>>, vector<1x18x18x4xf32>
    %1 = vector.shape_cast %0 : vector<1x18x18x4xf32> to vector<18x18x4xf32>
    %2 = vector.extract_strided_slice %1 {offsets = [1, 1, 0], sizes = [16, 16, 4], strides = [1, 1, 1]} : vector<18x18x4xf32> to vector<16x16x4xf32>
    %3 = vector.shape_cast %2 : vector<16x16x4xf32> to vector<256x4xf32>
    %c0_3 = arith.constant 0 : index
    %c0_4 = arith.constant 0 : index
    %4 = vector.load %arg2[%c0_3, %c0_4] : memref<4x12xf32, #tpu.memory_space<vmem>>, vector<4x12xf32>
    %cst = arith.constant dense<0.000000e+00> : vector<256x12xf32>
    %5 = tpu.matmul %3, %4, %cst {dimension_numbers = #tpu.dot_dimension_numbers<[1], [0], [0], [1], [0, 0, 1, 1], [], []>} : vector<256x4xf32>, vector<4x12xf32>, vector<256x12xf32> -> vector<256x12xf32>
    %c0_5 = arith.constant 0 : index
    %c0_6 = arith.constant 0 : index
    %6 = vector.load %arg3[%c0_5, %c0_6] : memref<1x12xf32, #tpu.memory_space<vmem>>, vector<1x12xf32>
    %7 = vector.broadcast %6 : vector<1x12xf32> to vector<256x12xf32>
    %8 = arith.addf %5, %7 : vector<256x12xf32>
    %9 = vector.shape_cast %8 : vector<256x12xf32> to vector<1x16x16x12xf32>
    %c0_7 = arith.constant 0 : index
    %c0_8 = arith.constant 0 : index
    %c0_9 = arith.constant 0 : index
    %c0_10 = arith.constant 0 : index
    %10 = vector.load %arg6[%c0_7, %c0_8, %c0_9, %c0_10] : memref<1x16x16x12xf32, #tpu.memory_space<vmem>>, vector<1x16x16x12xf32>
    tpu.vector_store %arg6[%c0_7, %c0_8, %c0_9, %c0_10], %9 {strides = array<i32>} : memref<1x16x16x12xf32, #tpu.memory_space<vmem>>, vector<1x16x16x12xf32>,
    %cst_11 = arith.constant 0.000000e+00 : f32
    %11 = vector.broadcast %cst_11 : f32 to vector<16x16x4xf32>
    %12 = vector.extract_strided_slice %1 {offsets = [0, 0, 0], sizes = [16, 16, 4], strides = [1, 1, 1]} : vector<18x18x4xf32> to vector<16x16x4xf32>
    %13 = arith.addf %11, %12 : vector<16x16x4xf32>
    %14 = vector.extract_strided_slice %1 {offsets = [0, 1, 0], sizes = [16, 16, 4], strides = [1, 1, 1]} : vector<18x18x4xf32> to vector<16x16x4xf32>
    %15 = arith.addf %13, %14 : vector<16x16x4xf32>
    %16 = vector.extract_strided_slice %1 {offsets = [0, 2, 0], sizes = [16, 16, 4], strides = [1, 1, 1]} : vector<18x18x4xf32> to vector<16x16x4xf32>
    %17 = arith.addf %15, %16 : vector<16x16x4xf32>
    %18 = vector.extract_strided_slice %1 {offsets = [1, 0, 0], sizes = [16, 16, 4], strides = [1, 1, 1]} : vector<18x18x4xf32> to vector<16x16x4xf32>
    %19 = arith.addf %17, %18 : vector<16x16x4xf32>
    %20 = vector.extract_strided_slice %1 {offsets = [1, 1, 0], sizes = [16, 16, 4], strides = [1, 1, 1]} : vector<18x18x4xf32> to vector<16x16x4xf32>
    %21 = arith.addf %19, %20 : vector<16x16x4xf32>
    %22 = vector.extract_strided_slice %1 {offsets = [1, 2, 0], sizes = [16, 16, 4], strides = [1, 1, 1]} : vector<18x18x4xf32> to vector<16x16x4xf32>
    %23 = arith.addf %21, %22 : vector<16x16x4xf32>
    %24 = vector.extract_strided_slice %1 {offsets = [2, 0, 0], sizes = [16, 16, 4], strides = [1, 1, 1]} : vector<18x18x4xf32> to vector<16x16x4xf32>
    %25 = arith.addf %23, %24 : vector<16x16x4xf32>
    %26 = vector.extract_strided_slice %1 {offsets = [2, 1, 0], sizes = [16, 16, 4], strides = [1, 1, 1]} : vector<18x18x4xf32> to vector<16x16x4xf32>
    %27 = arith.addf %25, %26 : vector<16x16x4xf32>
    %28 = vector.extract_strided_slice %1 {offsets = [2, 2, 0], sizes = [16, 16, 4], strides = [1, 1, 1]} : vector<18x18x4xf32> to vector<16x16x4xf32>
    %29 = arith.addf %27, %28 : vector<16x16x4xf32>
    %cst_12 = arith.constant 0.111111112 : f32
    %30 = vector.broadcast %cst_12 : f32 to vector<16x16x4xf32>
    %31 = arith.mulf %29, %30 : vector<16x16x4xf32>
    %32 = vector.shape_cast %31 : vector<16x16x4xf32> to vector<256x4xf32>
    %c0_13 = arith.constant 0 : index
    %c0_14 = arith.constant 0 : index
    %33 = vector.load %arg4[%c0_13, %c0_14] : memref<4x2xf32, #tpu.memory_space<vmem>>, vector<4x2xf32>
    %cst_15 = arith.constant dense<0.000000e+00> : vector<256x2xf32>
    %34 = tpu.matmul %32, %33, %cst_15 {dimension_numbers = #tpu.dot_dimension_numbers<[1], [0], [0], [1], [0, 0, 1, 1], [], []>} : vector<256x4xf32>, vector<4x2xf32>, vector<256x2xf32> -> vector<256x2xf32>
    %c0_16 = arith.constant 0 : index
    %c0_17 = arith.constant 0 : index
    %35 = vector.load %arg5[%c0_16, %c0_17] : memref<1x2xf32, #tpu.memory_space<vmem>>, vector<1x2xf32>
    %36 = vector.broadcast %35 : vector<1x2xf32> to vector<256x2xf32>
    %37 = arith.addf %34, %36 : vector<256x2xf32>
    %38 = vector.shape_cast %37 : vector<256x2xf32> to vector<1x16x16x2xf32>
    %c0_18 = arith.constant 0 : index
    %c0_19 = arith.constant 0 : index
    %c0_20 = arith.constant 0 : index
    %c0_21 = arith.constant 0 : index
    %39 = vector.load %arg7[%c0_18, %c0_19, %c0_20, %c0_21] : memref<1x16x16x2xf32, #tpu.memory_space<vmem>>, vector<1x16x16x2xf32>
    tpu.vector_store %arg7[%c0_18, %c0_19, %c0_20, %c0_21], %38 {strides = array<i32>} : memref<1x16x16x2xf32, #tpu.memory_space<vmem>>, vector<1x16x16x2xf32>,
    return
  }
  func.func @transform_0(%arg0: i32) -> (i32, i32, i32, i32) {
    %c0_i32 = arith.constant 0 : i32
    %c0_i32_0 = arith.constant 0 : i32
    %c0_i32_1 = arith.constant 0 : i32
    %c0_i32_2 = arith.constant 0 : i32
    return %arg0, %c0_i32, %c0_i32_0, %c0_i32_1 : i32, i32, i32, i32
  }
  func.func @transform_1(%arg0: i32) -> (i32, i32) {
    %c0_i32 = arith.constant 0 : i32
    %c0_i32_0 = arith.constant 0 : i32
    %c0_i32_1 = arith.constant 0 : i32
    return %c0_i32, %c0_i32_0 : i32, i32
  }
  func.func @transform_2(%arg0: i32) -> (i32, i32) {
    %c0_i32 = arith.constant 0 : i32
    %c0_i32_0 = arith.constant 0 : i32
    %c0_i32_1 = arith.constant 0 : i32
    return %c0_i32, %c0_i32_0 : i32, i32
  }
  func.func @transform_3(%arg0: i32) -> (i32, i32) {
    %c0_i32 = arith.constant 0 : i32
    %c0_i32_0 = arith.constant 0 : i32
    %c0_i32_1 = arith.constant 0 : i32
    return %c0_i32, %c0_i32_0 : i32, i32
  }
  func.func @transform_4(%arg0: i32) -> (i32, i32) {
    %c0_i32 = arith.constant 0 : i32
    %c0_i32_0 = arith.constant 0 : i32
    %c0_i32_1 = arith.constant 0 : i32
    return %c0_i32, %c0_i32_0 : i32, i32
  }
  func.func @transform_5(%arg0: i32) -> (i32, i32, i32, i32) {
    %c0_i32 = arith.constant 0 : i32
    %c0_i32_0 = arith.constant 0 : i32
    %c0_i32_1 = arith.constant 0 : i32
    %c0_i32_2 = arith.constant 0 : i32
    return %arg0, %c0_i32, %c0_i32_0, %c0_i32_1 : i32, i32, i32, i32
  }
  func.func @transform_6(%arg0: i32) -> (i32, i32, i32, i32) {
    %c0_i32 = arith.constant 0 : i32
    %c0_i32_0 = arith.constant 0 : i32
    %c0_i32_1 = arith.constant 0 : i32
    %c0_i32_2 = arith.constant 0 : i32
    return %arg0, %c0_i32, %c0_i32_0, %c0_i32_1 : i32, i32, i32, i32
  }
}

</mosaic_0001>

<bundles_post_ra>
// kernel: tpu_custom_call.1
= control target key start
LH: loop header
LB: loop body
LE: loop exit
PB: predicated region body
PF: predicated region fallthrough
CT: control target
= control target key end

     0   :  { %s2035_s21 = smov 0   ;;  %s2477_s0 = inlined_call_operand.vmem [shape: f32[2,18,18,4], index: 0, kind: input, shape index: {}]   ;;  %s2478_s1 = inlined_call_operand.vmem [shape: f32[4,12], index: 1, kind: input, shape index: {}]   ;;  %s2479_s2 = inlined_call_operand.vmem [shape: f32[1,12], index: 2, kind: input, shape index: {}]   ;;  %s2480_s3 = inlined_call_operand.vmem [shape: f32[4,2], index: 3, kind: input, shape index: {}]   ;;  %s2481_s4 = inlined_call_operand.vmem [shape: f32[1,2], index: 4, kind: input, shape index: {}]   ;;  %s2482_s5 = inlined_call_operand.vmem [shape: f32[2,16,16,12], index: 5, kind: output, shape index: {0}]   ;;  %s2483_s6 = inlined_call_operand.vmem [shape: f32[2,16,16,2], index: 6, kind: output, shape index: {1}]  }
   0x1 LB: > { %s1735_s22 = sadd.s32 4294967295, %s1998_s21   ;;  %p1739_p0 = scmp.ge.s32.totalorder %s1998_s21, 1  ;;  %s1998_s21 = sphi %s2035_s21, %s17_s21  }
   0x2   : > { %p215_p1 = scmp.lt.s32.totalorder %s1998_s21, 3 }
   0x4   : > { %p216_p2 = pnand %p1739_p0, %p215_p1 }
   0x5   : > { %v448_v0 = vld [vmem:[%s2478_s1] sm:$0xf] (!%p216_p2)  ;;  %vm521_vm0 = vcmask (!%p216_p2), 1043456   ;;  %p250_p3 = scmp.lt.s32.totalorder (!%p216_p2), %s1735_s22, 1  ;;  %vm367_vm1 = vcmask (!%p216_p2), 1046528   ;;  %vm456_vm2 = vcmask (!%p216_p2), 31744  }
   0x6   : > { %219 = sbr.rel (%p216_p2) target bundleno = 357 (0x165), region = 40  ;;  %1883 = vmatprep.subr.msk.mxu0 (!%p216_p2), %vm521_vm0, %v448_v0  ;;  %v1282_v1 = vld [vmem:[%s2480_s3] sm:$0xf] (!%p216_p2)  ;;  %vm887_vm3 = vcmask (!%p216_p2), 1045504   ;;  %vm750_vm4 = vcmask (!%p216_p2), 97280   ;;  %vm1614_vm5 = vcmask (!%p216_p2), 15360  }
   0x7   : > { %1884 = vmatpush3.msk.msra.mxu0 (!%p216_p2), %vm521_vm0, %v448_v0  ;;  %1933 = vmatprep.subr.msk.mxu1 (!%p216_p2), %vm521_vm0, %v1282_v1 }
   0x8   : > { %1934 = vmatpush3.msk.msra.mxu1 (!%p216_p2), %vm521_vm0, %v1282_v1 }
   0xd   : > { %s2485_s22 = smov (!%p250_p3, %s1735_s22), 1 }
   0xe   : > { %s1983_s27 = smul.u32 432, %s2485_s22  ;;  %s1815_s7 = sshll.u32 %s2485_s22, 8 }
   0xf   : > { %s2270_s12 = scalar_lea.vmem %s2482_s5, %s1815_s7  ;;  %s2298_s17 = scalar_lea.vmem %s2483_s6, %s1815_s7 }
  0x10   : > { %s2055_s30 = scalar_lea.vmem %s2477_s0, %s1983_s27 }
  0x11   : > { %v265_v2 = vld [vmem:[%s2055_s30] sm:$0xff]  ;;  %v266_v3 = vld [vmem:[%s2055_s30 + $0x8] sm:$0xff]  ;;  %v268_v4 = vld [vmem:[%s2055_s30 + $0x18] sm:$0xff] }
  0x12   : > { %v269_v5 = vld [vmem:[%s2055_s30 + $0x20] sm:$0xff]  ;;  %v368_v6 = vrot.slane %v268_v4, 1  ;;  %v818_v7 = vrot.slane %v265_v2, 1  ;;  %v819_v8 = vrot.slane %v266_v3, 1  ;;  %v888_v9 = vrot.slane %v265_v2, 2  ;;  %v2065_v17 = vld [vmem:[%s2055_s30 + $0x38] sm:$0xff] }
  0x13   : > { %v369_v10 = vrot.slane %v269_v5, 1  ;;  %v889_v11 = vrot.slane %v266_v3, 2  ;;  %v893_v12 = vrot.slane %v268_v4, 2  ;;  %v894_v13 = vrot.slane %v269_v5, 2  ;;  %v267_v14 = vld [vmem:[%s2055_s30 + $0x10] sm:$0x3] }
  0x14   : > { %v820_v15 = vsel %vm367_vm1, %v818_v7, %v819_v8  ;;  %v270_v16 = vld [vmem:[%s2055_s30 + $0x28] sm:$0x3]  ;;  %v273_v18 = vld [vmem:[%s2055_s30 + $0x40] sm:$0x3]  ;;  %v821_v19 = vrot.slane %v267_v14, 1  ;;  %v374_v26 = vrot.slane %v2065_v17, 1 }
  0x15   : > { %v370_v20 = vsel %vm367_vm1, %v368_v6, %v369_v10  ;;  %v855_v21 = vadd.f32 %v820_v15, %v265_v2  ;;  %v890_v22 = vsel %vm887_vm3, %v888_v9, %v889_v11  ;;  %v895_v23 = vsel %vm887_vm3, %v893_v12, %v894_v13  ;;  %v271_v28 = vld [vmem:[%s2055_s30 + $0x30] sm:$0xff]  ;;  %v274_v33 = vld [vmem:[%s2055_s30 + $0x48] sm:$0xff] }
  0x16   : > { %1885 = vmatprep.mubr.msk.f32.mxu0 %vm456_vm2, %v370_v20  ;;  %v857_v24 = vadd.f32 %v370_v20, %v268_v4  ;;  %v371_v25 = vrot.slane %v270_v16, 1  ;;  %v376_v27 = vrot.slane %v273_v18, 1  ;;  %v822_v30 = vsel %vm367_vm1, %v819_v8, %v821_v19  ;;  %v2079_v38 = vld [vmem:[%s2055_s30 + $0x50] sm:$0xff] }
  0x17   : > { %v1000_v29 = vadd.f32 %v890_v22, %v855_v21  ;;  %v891_v31 = vrot.slane %v267_v14, 2  ;;  %v896_v32 = vrot.slane %v270_v16, 2  ;;  %v856_v37 = vadd.f32 %v822_v30, %v266_v3  ;;  %v276_v3 = vld [vmem:[%s2055_s30 + $0x58] sm:$0x3]  ;;  %v277_v22 = vld [vmem:[%s2055_s30 + $0x60] sm:$0xff] }
  0x18   : > { %v1002_v34 = vadd.f32 %v895_v23, %v857_v24  ;;  %v372_v35 = vsel %vm367_vm1, %v369_v10, %v371_v25  ;;  %v377_v36 = vsel %vm367_vm1, %v374_v26, %v376_v27  ;;  %v373_v45 = vrot.slane %v271_v28, 1 }
  0x19   : > { %v1032_v39 = vadd.f32 %v1000_v29, %v268_v4  ;;  %1886 = vmatmul.mubr.msk.f32.vlgmr.msra.gmra.mrb[0].mxu0 %vm456_vm2, %v372_v35  ;;  %v858_v40 = vadd.f32 %v372_v35, %v269_v5  ;;  %v892_v41 = vsel %vm887_vm3, %v889_v11, %v891_v31  ;;  %v897_v42 = vsel %vm887_vm3, %v894_v13, %v896_v32 }
  0x1a   : > { %v1034_v43 = vadd.f32 %v1002_v34, %v271_v28  ;;  %v1001_v44 = vadd.f32 %v892_v41, %v856_v37  ;;  %v378_v46 = vrot.slane %v274_v33, 1  ;;  %v379_v49 = vrot.slane %v2079_v38, 1 }
  0x1b   : > { %v1066_v47 = vadd.f32 %v1032_v39, %v370_v20  ;;  %v1003_v48 = vadd.f32 %v897_v42, %v858_v40  ;;  %v898_v50 = vrot.slane %v271_v28, 2  ;;  %v375_v52 = vsel %vm367_vm1, %v373_v45, %v374_v26  ;;  %v279_v39 = vld [vmem:[%s2055_s30 + $0x70] sm:$0x3] }
  0x1c   : > { %v1033_v51 = vadd.f32 %v1001_v44, %v269_v5  ;;  %v899_v53 = vrot.slane %v2065_v17, 2  ;;  %v860_v54 = vadd.f32 %v377_v36, %v2065_v17  ;;  %v380_v57 = vsel %vm367_vm1, %v378_v46, %v379_v49  ;;  %1888 = vmatprep.mubr.msk.f32.mxu0 %vm456_vm2, %v375_v52 }
  0x1d   : > { %v1105_v55 = vadd.f32 %v1066_v47, %v895_v23  ;;  %v1035_v56 = vadd.f32 %v1003_v48, %v2065_v17  ;;  %v859_v58 = vadd.f32 %v375_v52, %v271_v28  ;;  %v1068_v61 = vadd.f32 %v1034_v43, %v375_v52  ;;  %1889 = vmatmul.mubr.msk.f32.gmra.mrb[2].mxu0 %vm456_vm2, %v377_v36 }
  0x1e   : > { %v1067_v59 = vadd.f32 %v1033_v51, %v372_v35  ;;  %v900_v60 = vsel %vm887_vm3, %v898_v50, %v899_v53  ;;  %v901_v62 = vrot.slane %v273_v18, 2  ;;  %v861_v2 = vadd.f32 %v380_v57, %v274_v33  ;;  %1891 = vmatprep.mubr.msk.f32.mxu0 %vm456_vm2, %v380_v57 }
  0x1f   : > { %v1069_v63 = vadd.f32 %v1035_v56, %v377_v36  ;;  %v1004_v0 = vadd.f32 %v900_v60, %v859_v58  ;;  %v1137_v1 = vadd.f32 %v1105_v55, %v271_v28  ;;  %v1107_v5 = vadd.f32 %v1068_v61, %v900_v60  ;;  %v278_v28 = vld [vmem:[%s2055_s30 + $0x68] sm:$0xff] }
  0x20   : > { %v1106_v4 = vadd.f32 %v1067_v59, %v897_v42  ;;  %v902_v6 = vsel %vm887_vm3, %v899_v53, %v901_v62  ;;  %v903_v7 = vrot.slane %v274_v33, 2  ;;  %v904_v14 = vrot.slane %v2079_v38, 2 }
  0x21   : > { %v1036_v8 = vadd.f32 %v1004_v0, %v274_v33  ;;  %v1179_v9 = vadd.f32 %v1137_v1, %v375_v52  ;;  %v1005_v10 = vadd.f32 %v902_v6, %v860_v54  ;;  %v1108_v11 = vadd.f32 %v1069_v63, %v902_v6  ;;  %v280_v52 = vld [vmem:[%s2055_s30 + $0x78] sm:$0xff] }
  0x22   : > { %v1138_v12 = vadd.f32 %v1106_v4, %v2065_v17  ;;  %v1139_v13 = vadd.f32 %v1107_v5, %v274_v33  ;;  %v381_v15 = vrot.slane %v276_v3, 1  ;;  %v906_v20 = vrot.slane %v276_v3, 2  ;;  %v282_v5 = vld [vmem:[%s2055_s30 + $0x88] sm:$0x3] }
  0x23   : > { %v1070_v16 = vadd.f32 %v1036_v8, %v380_v57  ;;  %v1218_v18 = vadd.f32 %v1179_v9, %v900_v60  ;;  %v1037_v19 = vadd.f32 %v1005_v10, %v2079_v38  ;;  %v905_v23 = vsel %vm887_vm3, %v903_v7, %v904_v14 }
  0x24   : > { %v1180_v21 = vadd.f32 %v1138_v12, %v377_v36  ;;  %v1181_v24 = vadd.f32 %v1139_v13, %v380_v57  ;;  %v382_v25 = vsel %vm367_vm1, %v379_v49, %v381_v15  ;;  %v1006_v17 = vadd.f32 %v905_v23, %v861_v2  ;;  %v281_v57 = vld [vmem:[%s2055_s30 + $0x80] sm:$0xff] }
  0x25   : > { %v1250_v26 = vmul.f32 0.11111111, %v1218_v18  ;;  %v1109_v27 = vadd.f32 %v1070_v16, %v905_v23  ;;  %v862_v29 = vadd.f32 %v382_v25, %v2079_v38  ;;  %1892 = vmatmul.mubr.msk.f32.gmra.mrb[4].mxu0 %vm456_vm2, %v382_v25  ;;  %v907_v32 = vsel %vm887_vm3, %v904_v14, %v906_v20  ;;  %v283_v20 = vld [vmem:[%s2055_s30 + $0x90] sm:$0xff] }
  0x26   : > { %v1219_v30 = vadd.f32 %v1180_v21, %v902_v6  ;;  %v1220_v31 = vadd.f32 %v1181_v24, %v905_v23  ;;  %v1071_v33 = vadd.f32 %v1037_v19, %v382_v25  ;;  %v1038_v34 = vadd.f32 %v1006_v17, %v277_v22 }
  0x27   : > { %1935 = vmatprep.mubr.msk.f32.mxu1 %vm456_vm2, %v1250_v26  ;;  %v1007_v35 = vadd.f32 %v907_v32, %v862_v29  ;;  %v1140_v36 = vadd.f32 %v1108_v11, %v2079_v38  ;;  %v383_v37 = vrot.slane %v277_v22, 1  ;;  %v384_v43 = vrot.slane %v278_v28, 1 }
  0x28   : > { %v1251_v40 = vmul.f32 0.11111111, %v1219_v30  ;;  %v1252_v41 = vmul.f32 0.11111111, %v1220_v31  ;;  %v1110_v42 = vadd.f32 %v1071_v33, %v907_v32  ;;  %v908_v46 = vrot.slane %v277_v22, 2 }
  0x29   : > { %v1039_v44 = vadd.f32 %v1007_v35, %v278_v28  ;;  %v1182_v45 = vadd.f32 %v1140_v36, %v382_v25  ;;  %v909_v47 = vrot.slane %v278_v28, 2  ;;  %v385_v48 = vsel %vm367_vm1, %v383_v37, %v384_v43  ;;  %v284_v25 = vld [vmem:[%s2055_s30 + $0x98] sm:$0xff]  ;;  %v285_v36 = vld [vmem:[%s2055_s30 + $0xa0] sm:$0x3] }
  0x2a   : > { %1936 = vmatmul.mubr.msk.f32.vlgmr.msra.gmra.mrb[0].mxu1 %vm456_vm2, %v1251_v40  ;;  %v1141_v49 = vadd.f32 %v1109_v27, %v277_v22  ;;  %v386_v50 = vrot.slane %v279_v39, 1  ;;  %v911_v51 = vrot.slane %v279_v39, 2  ;;  %v863_v53 = vadd.f32 %v385_v48, %v277_v22  ;;  %1894 = vmatprep.mubr.msk.f32.mxu0 %vm456_vm2, %v385_v48 }
  0x2b   : > { %1938 = vmatprep.mubr.msk.f32.mxu1 %vm456_vm2, %v1252_v41  ;;  %v1221_v38 = vadd.f32 %v1182_v45, %v907_v32  ;;  %v910_v54 = vsel %vm887_vm3, %v908_v46, %v909_v47  ;;  %v1072_v55 = vadd.f32 %v1038_v34, %v385_v48  ;;  %v1142_v60 = vadd.f32 %v1110_v42, %v278_v28 }
  0x2c   : > { %v1183_v56 = vadd.f32 %v1141_v49, %v385_v48  ;;  %v387_v58 = vsel %vm367_vm1, %v384_v43, %v386_v50  ;;  %v912_v59 = vsel %vm887_vm3, %v909_v47, %v911_v51  ;;  %v1008_v62 = vadd.f32 %v910_v54, %v863_v53  ;;  %v286_v51 = vld [vmem:[%s2055_s30 + $0xa8] sm:$0xff] }
  0x2d   : > { %v1253_v61 = vmul.f32 0.11111111, %v1221_v38  ;;  %v1111_v63 = vadd.f32 %v1072_v55, %v910_v54  ;;  %v864_v0 = vadd.f32 %v387_v58, %v278_v28  ;;  %1895 = vmatmul.mubr.msk.f32.gmra.mrb[6].mxu0 %vm456_vm2, %v387_v58  ;;  %v1073_v2 = vadd.f32 %v1039_v44, %v387_v58  ;;  %v287_v55 = vld [vmem:[%s2055_s30 + $0xb0] sm:$0xff] }
  0x2e   : > { %v1222_v1 = vadd.f32 %v1183_v56, %v910_v54  ;;  %v1184_v3 = vadd.f32 %v1142_v60, %v387_v58  ;;  %v388_v4 = vrot.slane %v280_v52, 1  ;;  %v1040_v6 = vadd.f32 %v1008_v62, %v280_v52 }
  0x2f   : > { %1939 = vmatmul.mubr.msk.f32.gmra.mrb[2].mxu1 %vm456_vm2, %v1253_v61  ;;  %v1009_v7 = vadd.f32 %v912_v59, %v864_v0  ;;  %v389_v8 = vrot.slane %v281_v57, 1  ;;  %v913_v9 = vrot.slane %v280_v52, 2  ;;  %v1112_v11 = vadd.f32 %v1073_v2, %v912_v59 }
  0x30   : > { %v1254_v10 = vmul.f32 0.11111111, %v1222_v1  ;;  %v1223_v12 = vadd.f32 %v1184_v3, %v912_v59  ;;  %v914_v13 = vrot.slane %v281_v57, 2  ;;  %v1143_v16 = vadd.f32 %v1111_v63, %v280_v52  ;;  %v288_v3 = vld [vmem:[%s2055_s30 + $0xb8] sm:$0x3] }
  0x31   : > { %v1041_v14 = vadd.f32 %v1009_v7, %v281_v57  ;;  %v390_v15 = vsel %vm367_vm1, %v388_v4, %v389_v8  ;;  %v391_v18 = vrot.slane %v282_v5, 1  ;;  %v916_v17 = vrot.slane %v282_v5, 2 }
  0x32   : > { %1941 = vmatprep.mubr.msk.f32.mxu1 %vm456_vm2, %v1254_v10  ;;  %v1255_v19 = vmul.f32 0.11111111, %v1223_v12  ;;  %v865_v21 = vadd.f32 %v390_v15, %v280_v52  ;;  %v915_v22 = vsel %vm887_vm3, %v913_v9, %v914_v13  ;;  %v1074_v23 = vadd.f32 %v1040_v6, %v390_v15  ;;  %1897 = vmatprep.mubr.msk.f32.mxu0 %vm456_vm2, %v390_v15 }
  0x33   : > { %v1185_v24 = vadd.f32 %v1143_v16, %v390_v15  ;;  %v392_v26 = vsel %vm367_vm1, %v389_v8, %v391_v18  ;;  %v1144_v27 = vadd.f32 %v1112_v11, %v281_v57  ;;  %v917_v33 = vsel %vm887_vm3, %v914_v13, %v916_v17  ;;  %v289_v18 = vld [vmem:[%s2055_s30 + $0xc0] sm:$0xff] }
  0x34   : > { %1942 = vmatmul.mubr.msk.f32.gmra.mrb[4].mxu1 %vm456_vm2, %v1255_v19  ;;  %v1010_v28 = vadd.f32 %v915_v22, %v865_v21  ;;  %v1113_v29 = vadd.f32 %v1074_v23, %v915_v22  ;;  %v866_v30 = vadd.f32 %v392_v26, %v281_v57  ;;  %v1075_v31 = vadd.f32 %v1041_v14, %v392_v26  ;;  %v290_v23 = vld [vmem:[%s2055_s30 + $0xc8] sm:$0xff] }
  0x35   : > { %v1224_v32 = vadd.f32 %v1185_v24, %v915_v22  ;;  %v1186_v34 = vadd.f32 %v1144_v27, %v392_v26  ;;  %1898 = vmatmul.mubr.msk.f32.gmra.mrb[8].mxu0 %vm456_vm2, %v392_v26  ;;  %v393_v35 = vrot.slane %v283_v20, 1  ;;  %v394_v41 = vrot.slane %v284_v25, 1 }
  0x36   : > { %v1042_v37 = vadd.f32 %v1010_v28, %v283_v20  ;;  %v1011_v39 = vadd.f32 %v917_v33, %v866_v30  ;;  %v1114_v40 = vadd.f32 %v1075_v31, %v917_v33  ;;  %v918_v44 = vrot.slane %v283_v20, 2 }
  0x37   : > { %v1256_v42 = vmul.f32 0.11111111, %v1224_v32  ;;  %v1225_v43 = vadd.f32 %v1186_v34, %v917_v33  ;;  %v919_v45 = vrot.slane %v284_v25, 2  ;;  %v395_v47 = vsel %vm367_vm1, %v393_v35, %v394_v41  ;;  %v291_v34 = vld [vmem:[%s2055_s30 + $0xd0] sm:$0x3] }
  0x38   : > { %v1043_v46 = vadd.f32 %v1011_v39, %v284_v25  ;;  %v1145_v48 = vadd.f32 %v1113_v29, %v283_v20  ;;  %v396_v49 = vrot.slane %v285_v36, 1  ;;  %v867_v38 = vadd.f32 %v395_v47, %v283_v20  ;;  %1900 = vmatprep.mubr.msk.f32.mxu0 %vm456_vm2, %v395_v47 }
  0x39   : > { %1944 = vmatprep.mubr.msk.f32.mxu1 %vm456_vm2, %v1256_v42  ;;  %v1257_v50 = vmul.f32 0.11111111, %v1225_v43  ;;  %v920_v52 = vsel %vm887_vm3, %v918_v44, %v919_v45  ;;  %v1076_v53 = vadd.f32 %v1042_v37, %v395_v47  ;;  %v921_v57 = vrot.slane %v285_v36, 2 }
  0x3a   : > { %v1187_v54 = vadd.f32 %v1145_v48, %v395_v47  ;;  %v397_v56 = vsel %vm367_vm1, %v394_v41, %v396_v49  ;;  %v1146_v58 = vadd.f32 %v1114_v40, %v284_v25  ;;  %v1012_v59 = vadd.f32 %v920_v52, %v867_v38  ;;  %v292_v49 = vld [vmem:[%s2055_s30 + $0xd8] sm:$0xff] }
  0x3b   : > { %1945 = vmatmul.mubr.msk.f32.gmra.mrb[6].mxu1 %vm456_vm2, %v1257_v50  ;;  %v1115_v60 = vadd.f32 %v1076_v53, %v920_v52  ;;  %v868_v61 = vadd.f32 %v397_v56, %v284_v25  ;;  %v1077_v62 = vadd.f32 %v1043_v46, %v397_v56  ;;  %v922_v0 = vsel %vm887_vm3, %v919_v45, %v921_v57  ;;  %v293_v53 = vld [vmem:[%s2055_s30 + $0xe0] sm:$0xff] }
  0x3c   : > { %v1226_v63 = vadd.f32 %v1187_v54, %v920_v52  ;;  %v1188_v1 = vadd.f32 %v1146_v58, %v397_v56  ;;  %1901 = vmatmul.mubr.msk.f32.gmra.mrb[10].mxu0 %vm456_vm2, %v397_v56  ;;  %v398_v2 = vrot.slane %v286_v51, 1  ;;  %v1044_v4 = vadd.f32 %v1012_v59, %v286_v51 }
  0x3d   : > { %v1013_v5 = vadd.f32 %v922_v0, %v868_v61  ;;  %v1116_v6 = vadd.f32 %v1077_v62, %v922_v0  ;;  %v399_v7 = vrot.slane %v287_v55, 1  ;;  %v923_v10 = vrot.slane %v286_v51, 2 }
  0x3e   : > { %v1258_v8 = vmul.f32 0.11111111, %v1226_v63  ;;  %v1227_v9 = vadd.f32 %v1188_v1, %v922_v0  ;;  %v924_v11 = vrot.slane %v287_v55, 2  ;;  %v1147_v14 = vadd.f32 %v1115_v60, %v286_v51  ;;  %v294_v1 = vld [vmem:[%s2055_s30 + $0xe8] sm:$0x3] }
  0x3f   : > { %v1045_v12 = vadd.f32 %v1013_v5, %v287_v55  ;;  %v400_v13 = vsel %vm367_vm1, %v398_v2, %v399_v7  ;;  %v401_v15 = vrot.slane %v288_v3, 1  ;;  %v926_v25 = vrot.slane %v288_v3, 2 }
  0x40   : > { %1947 = vmatprep.mubr.msk.f32.mxu1 %vm456_vm2, %v1258_v8  ;;  %v1259_v16 = vmul.f32 0.11111111, %v1227_v9  ;;  %v869_v19 = vadd.f32 %v400_v13, %v286_v51  ;;  %v925_v20 = vsel %vm887_vm3, %v923_v10, %v924_v11  ;;  %v1078_v21 = vadd.f32 %v1044_v4, %v400_v13  ;;  %1903 = vmatprep.mubr.msk.f32.mxu0 %vm456_vm2, %v400_v13 }
  0x41   : > { %v1189_v22 = vadd.f32 %v1147_v14, %v400_v13  ;;  %v402_v24 = vsel %vm367_vm1, %v399_v7, %v401_v15  ;;  %v1148_v26 = vadd.f32 %v1116_v6, %v287_v55  ;;  %v927_v31 = vsel %vm887_vm3, %v924_v11, %v926_v25  ;;  %v295_v15 = vld [vmem:[%s2055_s30 + $0xf0] sm:$0xff] }
  0x42   : > { %1948 = vmatmul.mubr.msk.f32.gmra.mrb[8].mxu1 %vm456_vm2, %v1259_v16  ;;  %v1014_v17 = vadd.f32 %v925_v20, %v869_v19  ;;  %v1117_v27 = vadd.f32 %v1078_v21, %v925_v20  ;;  %v870_v28 = vadd.f32 %v402_v24, %v287_v55  ;;  %v1079_v29 = vadd.f32 %v1045_v12, %v402_v24  ;;  %v296_v21 = vld [vmem:[%s2055_s30 + $0xf8] sm:$0xff] }
  0x43   : > { %v1228_v30 = vadd.f32 %v1189_v22, %v925_v20  ;;  %v1190_v32 = vadd.f32 %v1148_v26, %v402_v24  ;;  %1904 = vmatmul.mubr.msk.f32.gmra.mrb[12].mxu0 %vm456_vm2, %v402_v24  ;;  %v403_v33 = vrot.slane %v289_v18, 1  ;;  %v404_v39 = vrot.slane %v290_v23, 1 }
  0x44   : > { %v1046_v35 = vadd.f32 %v1014_v17, %v289_v18  ;;  %v1015_v36 = vadd.f32 %v927_v31, %v870_v28  ;;  %v1118_v37 = vadd.f32 %v1079_v29, %v927_v31  ;;  %v928_v42 = vrot.slane %v289_v18, 2 }
  0x45   : > { %v1260_v40 = vmul.f32 0.11111111, %v1228_v30  ;;  %v1229_v41 = vadd.f32 %v1190_v32, %v927_v31  ;;  %v929_v43 = vrot.slane %v290_v23, 2  ;;  %v405_v45 = vsel %vm367_vm1, %v403_v33, %v404_v39  ;;  %v297_v32 = vld [vmem:[%s2055_s30 + $0x100] sm:$0x3] }
  0x46   : > { %v1047_v44 = vadd.f32 %v1015_v36, %v290_v23  ;;  %v1149_v46 = vadd.f32 %v1117_v27, %v289_v18  ;;  %v406_v47 = vrot.slane %v291_v34, 1  ;;  %v871_v50 = vadd.f32 %v405_v45, %v289_v18  ;;  %1906 = vmatprep.mubr.msk.f32.mxu0 %vm456_vm2, %v405_v45 }
  0x47   : > { %1950 = vmatprep.mubr.msk.f32.mxu1 %vm456_vm2, %v1260_v40  ;;  %v1261_v48 = vmul.f32 0.11111111, %v1229_v41  ;;  %v930_v51 = vsel %vm887_vm3, %v928_v42, %v929_v43  ;;  %v1080_v38 = vadd.f32 %v1046_v35, %v405_v45  ;;  %v931_v55 = vrot.slane %v291_v34, 2 }
  0x48   : > { %v1191_v52 = vadd.f32 %v1149_v46, %v405_v45  ;;  %v407_v54 = vsel %vm367_vm1, %v404_v39, %v406_v47  ;;  %v1150_v56 = vadd.f32 %v1118_v37, %v290_v23  ;;  %v1016_v57 = vadd.f32 %v930_v51, %v871_v50  ;;  %v298_v47 = vld [vmem:[%s2055_s30 + $0x108] sm:$0xff] }
  0x49   : > { %1951 = vmatmul.mubr.msk.f32.gmra.mrb[10].mxu1 %vm456_vm2, %v1261_v48  ;;  %v1119_v58 = vadd.f32 %v1080_v38, %v930_v51  ;;  %v872_v59 = vadd.f32 %v407_v54, %v290_v23  ;;  %v1081_v60 = vadd.f32 %v1047_v44, %v407_v54  ;;  %v932_v62 = vsel %vm887_vm3, %v929_v43, %v931_v55  ;;  %v299_v38 = vld [vmem:[%s2055_s30 + $0x110] sm:$0xff] }
  0x4a   : > { %v1230_v61 = vadd.f32 %v1191_v52, %v930_v51  ;;  %v1192_v63 = vadd.f32 %v1150_v56, %v407_v54  ;;  %1907 = vmatmul.mubr.msk.f32.gmra.mrb[14].mxu0 %vm456_vm2, %v407_v54  ;;  %v408_v0 = vrot.slane %v292_v49, 1  ;;  %v1048_v2 = vadd.f32 %v1016_v57, %v292_v49 }
  0x4b   : > { %v1017_v3 = vadd.f32 %v932_v62, %v872_v59  ;;  %v1120_v4 = vadd.f32 %v1081_v60, %v932_v62  ;;  %v409_v5 = vrot.slane %v293_v53, 1  ;;  %v933_v8 = vrot.slane %v292_v49, 2 }
  0x4c   : > { %v1262_v6 = vmul.f32 0.11111111, %v1230_v61  ;;  %v1231_v7 = vadd.f32 %v1192_v63, %v932_v62  ;;  %v934_v9 = vrot.slane %v293_v53, 2  ;;  %v1151_v12 = vadd.f32 %v1119_v58, %v292_v49  ;;  %v300_v63 = vld [vmem:[%s2055_s30 + $0x118] sm:$0x3] }
  0x4d   : > { %v1049_v10 = vadd.f32 %v1017_v3, %v293_v53  ;;  %v410_v11 = vsel %vm367_vm1, %v408_v0, %v409_v5  ;;  %v411_v13 = vrot.slane %v294_v1, 1  ;;  %v936_v23 = vrot.slane %v294_v1, 2 }
  0x4e   : > { %1953 = vmatprep.mubr.msk.f32.mxu1 %vm456_vm2, %v1262_v6  ;;  %v1263_v14 = vmul.f32 0.11111111, %v1231_v7  ;;  %v873_v16 = vadd.f32 %v410_v11, %v292_v49  ;;  %v935_v18 = vsel %vm887_vm3, %v933_v8, %v934_v9  ;;  %v1082_v19 = vadd.f32 %v1048_v2, %v410_v11  ;;  %1909 = vmatprep.mubr.msk.f32.mxu0 %vm456_vm2, %v410_v11 }
  0x4f   : > { %v1193_v20 = vadd.f32 %v1151_v12, %v410_v11  ;;  %v412_v22 = vsel %vm367_vm1, %v409_v5, %v411_v13  ;;  %v1152_v24 = vadd.f32 %v1120_v4, %v293_v53  ;;  %v937_v29 = vsel %vm887_vm3, %v934_v9, %v936_v23  ;;  %v301_v13 = vld [vmem:[%s2055_s30 + $0x120] sm:$0xff] }
  0x50   : > { %1954 = vmatmul.mubr.msk.f32.gmra.mrb[12].mxu1 %vm456_vm2, %v1263_v14  ;;  %v1018_v25 = vadd.f32 %v935_v18, %v873_v16  ;;  %v1121_v26 = vadd.f32 %v1082_v19, %v935_v18  ;;  %v874_v17 = vadd.f32 %v412_v22, %v293_v53  ;;  %v1083_v27 = vadd.f32 %v1049_v10, %v412_v22  ;;  %v302_v19 = vld [vmem:[%s2055_s30 + $0x128] sm:$0xff] }
  0x51   : > { %v1232_v28 = vadd.f32 %v1193_v20, %v935_v18  ;;  %v1194_v30 = vadd.f32 %v1152_v24, %v412_v22  ;;  %1910 = vmatmul.mubr.msk.f32.gmra.mrb[16].mxu0 %vm456_vm2, %v412_v22  ;;  %v413_v31 = vrot.slane %v295_v15, 1  ;;  %v414_v36 = vrot.slane %v296_v21, 1 }
  0x52   : > { %v1050_v33 = vadd.f32 %v1018_v25, %v295_v15  ;;  %v1019_v34 = vadd.f32 %v937_v29, %v874_v17  ;;  %v1122_v35 = vadd.f32 %v1083_v27, %v937_v29  ;;  %v938_v40 = vrot.slane %v295_v15, 2 }
  0x53   : > { %v1264_v37 = vmul.f32 0.11111111, %v1232_v28  ;;  %v1233_v39 = vadd.f32 %v1194_v30, %v937_v29  ;;  %v939_v41 = vrot.slane %v296_v21, 2  ;;  %v415_v43 = vsel %vm367_vm1, %v413_v31, %v414_v36  ;;  %v303_v30 = vld [vmem:[%s2055_s30 + $0x130] sm:$0x3] }
  0x54   : > { %v1051_v42 = vadd.f32 %v1019_v34, %v296_v21  ;;  %v1153_v44 = vadd.f32 %v1121_v26, %v295_v15  ;;  %v416_v45 = vrot.slane %v297_v32, 1  ;;  %v875_v48 = vadd.f32 %v415_v43, %v295_v15  ;;  %1912 = vmatprep.mubr.msk.f32.mxu0 %vm456_vm2, %v415_v43 }
  0x55   : > { %1956 = vmatprep.mubr.msk.f32.mxu1 %vm456_vm2, %v1264_v37  ;;  %v1265_v46 = vmul.f32 0.11111111, %v1233_v39  ;;  %v940_v49 = vsel %vm887_vm3, %v938_v40, %v939_v41  ;;  %v1084_v50 = vadd.f32 %v1050_v33, %v415_v43  ;;  %v941_v53 = vrot.slane %v297_v32, 2 }
  0x56   : > { %v1195_v51 = vadd.f32 %v1153_v44, %v415_v43  ;;  %v417_v52 = vsel %vm367_vm1, %v414_v36, %v416_v45  ;;  %v1154_v54 = vadd.f32 %v1122_v35, %v296_v21  ;;  %v1020_v55 = vadd.f32 %v940_v49, %v875_v48  ;;  %v304_v45 = vld [vmem:[%s2055_s30 + $0x138] sm:$0xff] }
  0x57   : > { %1957 = vmatmul.mubr.msk.f32.gmra.mrb[14].mxu1 %vm456_vm2, %v1265_v46  ;;  %v1123_v56 = vadd.f32 %v1084_v50, %v940_v49  ;;  %v876_v57 = vadd.f32 %v417_v52, %v296_v21  ;;  %v1085_v58 = vadd.f32 %v1051_v42, %v417_v52  ;;  %v942_v60 = vsel %vm887_vm3, %v939_v41, %v941_v53  ;;  %v305_v50 = vld [vmem:[%s2055_s30 + $0x140] sm:$0xff] }
  0x58   : > { %v1234_v59 = vadd.f32 %v1195_v51, %v940_v49  ;;  %v1196_v61 = vadd.f32 %v1154_v54, %v417_v52  ;;  %1913 = vmatmul.mubr.msk.f32.gmra.mrb[18].mxu0 %vm456_vm2, %v417_v52  ;;  %v418_v62 = vrot.slane %v298_v47, 1  ;;  %v1052_v0 = vadd.f32 %v1020_v55, %v298_v47 }
  0x59   : > { %v1021_v1 = vadd.f32 %v942_v60, %v876_v57  ;;  %v1124_v2 = vadd.f32 %v1085_v58, %v942_v60  ;;  %v419_v3 = vrot.slane %v299_v38, 1  ;;  %v943_v6 = vrot.slane %v298_v47, 2 }
  0x5a   : > { %v1266_v4 = vmul.f32 0.11111111, %v1234_v59  ;;  %v1235_v5 = vadd.f32 %v1196_v61, %v942_v60  ;;  %v944_v7 = vrot.slane %v299_v38, 2  ;;  %v1155_v10 = vadd.f32 %v1123_v56, %v298_v47  ;;  %v306_v61 = vld [vmem:[%s2055_s30 + $0x148] sm:$0x3] }
  0x5b   : > { %v1053_v8 = vadd.f32 %v1021_v1, %v299_v38  ;;  %v420_v9 = vsel %vm367_vm1, %v418_v62, %v419_v3  ;;  %v421_v11 = vrot.slane %v300_v63, 1  ;;  %v946_v21 = vrot.slane %v300_v63, 2 }
  0x5c   : > { %1959 = vmatprep.mubr.msk.f32.mxu1 %vm456_vm2, %v1266_v4  ;;  %v1267_v12 = vmul.f32 0.11111111, %v1235_v5  ;;  %v877_v14 = vadd.f32 %v420_v9, %v298_v47  ;;  %v945_v15 = vsel %vm887_vm3, %v943_v6, %v944_v7  ;;  %v1086_v16 = vadd.f32 %v1052_v0, %v420_v9  ;;  %1915 = vmatprep.mubr.msk.f32.mxu0 %vm456_vm2, %v420_v9 }
  0x5d   : > { %v1197_v18 = vadd.f32 %v1155_v10, %v420_v9  ;;  %v422_v20 = vsel %vm367_vm1, %v419_v3, %v421_v11  ;;  %v1156_v22 = vadd.f32 %v1124_v2, %v299_v38  ;;  %v947_v27 = vsel %vm887_vm3, %v944_v7, %v946_v21  ;;  %v307_v11 = vld [vmem:[%s2055_s30 + $0x150] sm:$0xff] }
  0x5e   : > { %1960 = vmatmul.mubr.msk.f32.gmra.mrb[16].mxu1 %vm456_vm2, %v1267_v12  ;;  %v1022_v23 = vadd.f32 %v945_v15, %v877_v14  ;;  %v1125_v24 = vadd.f32 %v1086_v16, %v945_v15  ;;  %v878_v25 = vadd.f32 %v422_v20, %v299_v38  ;;  %v1087_v26 = vadd.f32 %v1053_v8, %v422_v20  ;;  %v308_v16 = vld [vmem:[%s2055_s30 + $0x158] sm:$0xff] }
  0x5f   : > { %v1236_v17 = vadd.f32 %v1197_v18, %v945_v15  ;;  %v1198_v28 = vadd.f32 %v1156_v22, %v422_v20  ;;  %1916 = vmatmul.mubr.msk.f32.gmra.mrb[20].mxu0 %vm456_vm2, %v422_v20  ;;  %v423_v29 = vrot.slane %v301_v13, 1  ;;  %v424_v34 = vrot.slane %v302_v19, 1 }
  0x60   : > { %v1054_v31 = vadd.f32 %v1022_v23, %v301_v13  ;;  %v1023_v32 = vadd.f32 %v947_v27, %v878_v25  ;;  %v1126_v33 = vadd.f32 %v1087_v26, %v947_v27  ;;  %v948_v37 = vrot.slane %v301_v13, 2 }
  0x61   : > { %v1268_v35 = vmul.f32 0.11111111, %v1236_v17  ;;  %v1237_v36 = vadd.f32 %v1198_v28, %v947_v27  ;;  %v949_v39 = vrot.slane %v302_v19, 2  ;;  %v425_v41 = vsel %vm367_vm1, %v423_v29, %v424_v34  ;;  %v309_v28 = vld [vmem:[%s2055_s30 + $0x160] sm:$0x3] }
  0x62   : > { %v1055_v40 = vadd.f32 %v1023_v32, %v302_v19  ;;  %v1157_v42 = vadd.f32 %v1125_v24, %v301_v13  ;;  %v426_v43 = vrot.slane %v303_v30, 1  ;;  %v879_v46 = vadd.f32 %v425_v41, %v301_v13  ;;  %1918 = vmatprep.mubr.msk.f32.mxu0 %vm456_vm2, %v425_v41 }
  0x63   : > { %1962 = vmatprep.mubr.msk.f32.mxu1 %vm456_vm2, %v1268_v35  ;;  %v1269_v44 = vmul.f32 0.11111111, %v1237_v36  ;;  %v950_v47 = vsel %vm887_vm3, %v948_v37, %v949_v39  ;;  %v1088_v48 = vadd.f32 %v1054_v31, %v425_v41  ;;  %v951_v38 = vrot.slane %v303_v30, 2 }
  0x64   : > { %v1199_v49 = vadd.f32 %v1157_v42, %v425_v41  ;;  %v427_v51 = vsel %vm367_vm1, %v424_v34, %v426_v43  ;;  %v1158_v52 = vadd.f32 %v1126_v33, %v302_v19  ;;  %v1024_v53 = vadd.f32 %v950_v47, %v879_v46  ;;  %v310_v43 = vld [vmem:[%s2055_s30 + $0x168] sm:$0xff] }
  0x65   : > { %1963 = vmatmul.mubr.msk.f32.gmra.mrb[18].mxu1 %vm456_vm2, %v1269_v44  ;;  %v1127_v54 = vadd.f32 %v1088_v48, %v950_v47  ;;  %v880_v55 = vadd.f32 %v427_v51, %v302_v19  ;;  %v1089_v56 = vadd.f32 %v1055_v40, %v427_v51  ;;  %v952_v58 = vsel %vm887_vm3, %v949_v39, %v951_v38  ;;  %v311_v48 = vld [vmem:[%s2055_s30 + $0x170] sm:$0xff] }
  0x66   : > { %v1238_v57 = vadd.f32 %v1199_v49, %v950_v47  ;;  %v1200_v59 = vadd.f32 %v1158_v52, %v427_v51  ;;  %1919 = vmatmul.mubr.msk.f32.gmra.mrb[22].mxu0 %vm456_vm2, %v427_v51  ;;  %v428_v60 = vrot.slane %v304_v45, 1  ;;  %v1056_v62 = vadd.f32 %v1024_v53, %v304_v45 }
  0x67   : > { %v1025_v63 = vadd.f32 %v952_v58, %v880_v55  ;;  %v1128_v0 = vadd.f32 %v1089_v56, %v952_v58  ;;  %v429_v1 = vrot.slane %v305_v50, 1  ;;  %v953_v4 = vrot.slane %v304_v45, 2 }
  0x68   : > { %v1270_v2 = vmul.f32 0.11111111, %v1238_v57  ;;  %v1239_v3 = vadd.f32 %v1200_v59, %v952_v58  ;;  %v954_v5 = vrot.slane %v305_v50, 2  ;;  %v1159_v8 = vadd.f32 %v1127_v54, %v304_v45  ;;  %v312_v59 = vld [vmem:[%s2055_s30 + $0x178] sm:$0x3] }
  0x69   : > { %v1057_v6 = vadd.f32 %v1025_v63, %v305_v50  ;;  %v430_v7 = vsel %vm367_vm1, %v428_v60, %v429_v1  ;;  %v431_v9 = vrot.slane %v306_v61, 1  ;;  %v956_v19 = vrot.slane %v306_v61, 2 }
  0x6a   : > { %1965 = vmatprep.mubr.msk.f32.mxu1 %vm456_vm2, %v1270_v2  ;;  %v1271_v10 = vmul.f32 0.11111111, %v1239_v3  ;;  %v881_v12 = vadd.f32 %v430_v7, %v304_v45  ;;  %v955_v13 = vsel %vm887_vm3, %v953_v4, %v954_v5  ;;  %v1090_v14 = vadd.f32 %v1056_v62, %v430_v7  ;;  %1921 = vmatprep.mubr.msk.f32.mxu0 %vm456_vm2, %v430_v7 }
  0x6b   : > { %v1201_v15 = vadd.f32 %v1159_v8, %v430_v7  ;;  %v432_v18 = vsel %vm367_vm1, %v429_v1, %v431_v9  ;;  %v1160_v20 = vadd.f32 %v1128_v0, %v305_v50  ;;  %v957_v26 = vsel %vm887_vm3, %v954_v5, %v956_v19 }
  0x6c   : > { %1966 = vmatmul.mubr.msk.f32.gmra.mrb[20].mxu1 %vm456_vm2, %v1271_v10  ;;  %v1026_v21 = vadd.f32 %v955_v13, %v881_v12  ;;  %v1129_v22 = vadd.f32 %v1090_v14, %v955_v13  ;;  %v882_v23 = vadd.f32 %v432_v18, %v305_v50  ;;  %v1091_v24 = vadd.f32 %v1057_v6, %v432_v18  ;;  %v313_v12 = vld [vmem:[%s2055_s30 + $0x180] sm:$0xff] }
  0x6d   : > { %v1240_v25 = vadd.f32 %v1201_v15, %v955_v13  ;;  %v1202_v17 = vadd.f32 %v1160_v20, %v432_v18  ;;  %1922 = vmatmul.mubr.msk.f32.gmra.mrb[24].mxu0 %vm456_vm2, %v432_v18  ;;  %v433_v27 = vrot.slane %v307_v11, 1  ;;  %v434_v32 = vrot.slane %v308_v16, 1  ;;  %v314_v18 = vld [vmem:[%s2055_s30 + $0x188] sm:$0xff] }
  0x6e   : > { %v1058_v29 = vadd.f32 %v1026_v21, %v307_v11  ;;  %v1027_v30 = vadd.f32 %v957_v26, %v882_v23  ;;  %v1130_v31 = vadd.f32 %v1091_v24, %v957_v26  ;;  %v958_v35 = vrot.slane %v307_v11, 2 }
  0x6f   : > { %v1272_v33 = vmul.f32 0.11111111, %v1240_v25  ;;  %v1241_v34 = vadd.f32 %v1202_v17, %v957_v26  ;;  %v959_v36 = vrot.slane %v308_v16, 2  ;;  %v435_v39 = vsel %vm367_vm1, %v433_v27, %v434_v32  ;;  %v315_v17 = vld [vmem:[%s2055_s30 + $0x190] sm:$0x3] }
  0x70   : > { %v1059_v37 = vadd.f32 %v1027_v30, %v308_v16  ;;  %v1161_v40 = vadd.f32 %v1129_v22, %v307_v11  ;;  %v436_v41 = vrot.slane %v309_v28, 1  ;;  %v883_v44 = vadd.f32 %v435_v39, %v307_v11  ;;  %1924 = vmatprep.mubr.msk.f32.mxu0 %vm456_vm2, %v435_v39 }
  0x71   : > { %1968 = vmatprep.mubr.msk.f32.mxu1 %vm456_vm2, %v1272_v33  ;;  %v1273_v42 = vmul.f32 0.11111111, %v1241_v34  ;;  %v960_v45 = vsel %vm887_vm3, %v958_v35, %v959_v36  ;;  %v1092_v46 = vadd.f32 %v1058_v29, %v435_v39  ;;  %v961_v50 = vrot.slane %v309_v28, 2  ;;  %v316_v35 = vld [vmem:[%s2055_s30 + $0x198] sm:$0xff] }
  0x72   : > { %v1203_v47 = vadd.f32 %v1161_v40, %v435_v39  ;;  %v437_v49 = vsel %vm367_vm1, %v434_v32, %v436_v41  ;;  %v1162_v51 = vadd.f32 %v1130_v31, %v308_v16  ;;  %v1028_v38 = vadd.f32 %v960_v45, %v883_v44  ;;  %v317_v41 = vld [vmem:[%s2055_s30 + $0x1a0] sm:$0xff] }
  0x73   : > { %1969 = vmatmul.mubr.msk.f32.gmra.mrb[22].mxu1 %vm456_vm2, %v1273_v42  ;;  %v1131_v52 = vadd.f32 %v1092_v46, %v960_v45  ;;  %v884_v53 = vadd.f32 %v437_v49, %v308_v16  ;;  %v1093_v54 = vadd.f32 %v1059_v37, %v437_v49  ;;  %v962_v56 = vsel %vm887_vm3, %v959_v36, %v961_v50  ;;  %v318_v50 = vld [vmem:[%s2055_s30 + $0x1a8] sm:$0x3] }
  0x74   : > { %v1242_v55 = vadd.f32 %v1203_v47, %v960_v45  ;;  %v1204_v57 = vadd.f32 %v1162_v51, %v437_v49  ;;  %1925 = vmatmul.mubr.msk.f32.gmra.mrb[26].mxu0 %vm456_vm2, %v437_v49  ;;  %v438_v58 = vrot.slane %v310_v43, 1  ;;  %v1060_v60 = vadd.f32 %v1028_v38, %v310_v43 }
  0x75   : > { %v1029_v61 = vadd.f32 %v962_v56, %v884_v53  ;;  %v1132_v62 = vadd.f32 %v1093_v54, %v962_v56  ;;  %v439_v63 = vrot.slane %v311_v48, 1  ;;  %v963_v2 = vrot.slane %v310_v43, 2 }
  0x76   : > { %v1274_v0 = vmul.f32 0.11111111, %v1242_v55  ;;  %v1243_v1 = vadd.f32 %v1204_v57, %v962_v56  ;;  %v964_v3 = vrot.slane %v311_v48, 2  ;;  %v1163_v6 = vadd.f32 %v1131_v52, %v310_v43 }
  0x77   : > { %v1061_v4 = vadd.f32 %v1029_v61, %v311_v48  ;;  %v440_v5 = vsel %vm367_vm1, %v438_v58, %v439_v63  ;;  %v441_v7 = vrot.slane %v312_v59, 1  ;;  %v966_v15 = vrot.slane %v312_v59, 2 }
  0x78   : > { %1971 = vmatprep.mubr.msk.f32.mxu1 %vm456_vm2, %v1274_v0  ;;  %v1275_v8 = vmul.f32 0.11111111, %v1243_v1  ;;  %v885_v9 = vadd.f32 %v440_v5, %v310_v43  ;;  %v965_v10 = vsel %vm887_vm3, %v963_v2, %v964_v3  ;;  %v1094_v11 = vadd.f32 %v1060_v60, %v440_v5  ;;  %1927 = vmatprep.mubr.msk.f32.mxu0 %vm456_vm2, %v440_v5 }
  0x79   : > { %v1205_v13 = vadd.f32 %v1163_v6, %v440_v5  ;;  %v442_v14 = vsel %vm367_vm1, %v439_v63, %v441_v7  ;;  %v1164_v16 = vadd.f32 %v1132_v62, %v311_v48  ;;  %v967_v24 = vsel %vm887_vm3, %v964_v3, %v966_v15 }
  0x7a   : > { %1972 = vmatmul.mubr.msk.f32.gmra.mrb[24].mxu1 %vm456_vm2, %v1275_v8  ;;  %v1030_v19 = vadd.f32 %v965_v10, %v885_v9  ;;  %v1133_v20 = vadd.f32 %v1094_v11, %v965_v10  ;;  %v886_v21 = vadd.f32 %v442_v14, %v311_v48  ;;  %v1095_v22 = vadd.f32 %v1061_v4, %v442_v14 }
  0x7b   : > { %v1244_v23 = vadd.f32 %v1205_v13, %v965_v10  ;;  %v1206_v25 = vadd.f32 %v1164_v16, %v442_v14  ;;  %1928 = vmatmul.mubr.msk.f32.gmra.mrb[28].mxu0 %vm456_vm2, %v442_v14  ;;  %v443_v26 = vrot.slane %v313_v12, 1  ;;  %v444_v29 = vrot.slane %v314_v18, 1 }
  0x7c   : > { %v1031_v27 = vadd.f32 %v967_v24, %v886_v21  ;;  %v1134_v28 = vadd.f32 %v1095_v22, %v967_v24  ;;  %v1062_v30 = vadd.f32 %v1030_v19, %v313_v12  ;;  %v1098_v33 = vrot.slane %v313_v12, 2 }
  0x7d   : > { %v1276_v31 = vmul.f32 0.11111111, %v1244_v23  ;;  %v1245_v32 = vadd.f32 %v1206_v25, %v967_v24  ;;  %v1099_v34 = vrot.slane %v314_v18, 2  ;;  %v445_v36 = vsel %vm367_vm1, %v443_v26, %v444_v29  ;;  %v2289_v26 = vld [vmem:[%s2481_s4] ss:$0 sm:$0xff] }
  0x7e   : > { %v1165_v37 = vadd.f32 %v1133_v20, %v313_v12  ;;  %v446_v39 = vrot.slane %v315_v17, 1  ;;  %v1063_v40 = vadd.f32 %v1031_v27, %v314_v18  ;;  %v1096_v43 = vadd.f32 %v1062_v30, %v445_v36  ;;  %1930 = vmatprep.mubr.msk.f32.mxu0 %vm456_vm2, %v445_v36  ;;  %v2265_v12 = vld [vmem:[%s2479_s2] ss:$0 sm:$0xff] }
  0x7f   : > { %1974 = vmatprep.mubr.msk.f32.mxu1 %vm456_vm2, %v1276_v31  ;;  %v1277_v42 = vmul.f32 0.11111111, %v1245_v32  ;;  %v1100_v44 = vsel %vm887_vm3, %v1098_v33, %v1099_v34  ;;  %v1101_v45 = vrot.slane %v315_v17, 2  ;;  %v1166_v48 = vadd.f32 %v1134_v28, %v314_v18 }
  0x80   : > { %v1207_v46 = vadd.f32 %v1165_v37, %v445_v36  ;;  %v447_v47 = vsel %vm367_vm1, %v444_v29, %v446_v39  ;;  %v1172_v49 = vrot.slane %v316_v35, 1  ;;  %v1135_v51 = vadd.f32 %v1100_v44, %v1096_v43 }
  0x81   : > { %1975 = vmatmul.mubr.msk.f32.gmra.mrb[26].mxu1 %vm456_vm2, %v1277_v42  ;;  %v1097_v38 = vadd.f32 %v1063_v40, %v447_v47  ;;  %v1102_v52 = vsel %vm887_vm3, %v1099_v34, %v1101_v45  ;;  %1931 = vmatmul.mubr.msk.f32.gmra.mrb[30].mxu0 %vm456_vm2, %v447_v47  ;;  %v1173_v53 = vrot.slane %v317_v41, 1  ;;  %v1208_v55 = vadd.f32 %v1166_v48, %v447_v47 }
  0x82   : > { %v1246_v54 = vadd.f32 %v1207_v46, %v1100_v44  ;;  %v1211_v56 = vrot.slane %v316_v35, 2  ;;  %v1212_v57 = vrot.slane %v317_v41, 2  ;;  %v1167_v59 = vadd.f32 %v1135_v51, %v316_v35 }
  0x83   : > { %v1136_v58 = vadd.f32 %v1102_v52, %v1097_v38  ;;  %v1174_v60 = vsel %vm367_vm1, %v1172_v49, %v1173_v53  ;;  %v1175_v61 = vrot.slane %v318_v50, 1  ;;  %v1247_v63 = vadd.f32 %v1208_v55, %v1102_v52 }
  0x84   : > { %v1278_v62 = vmul.f32 0.11111111, %v1246_v54  ;;  %v1213_v0 = vsel %vm887_vm3, %v1211_v56, %v1212_v57  ;;  %v1214_v1 = vrot.slane %v318_v50, 2  ;;  %v1209_v2 = vadd.f32 %v1174_v60, %v1167_v59 }
  0x85   : > { %v1168_v3 = vadd.f32 %v1136_v58, %v317_v41  ;;  %v1176_v4 = vsel %vm367_vm1, %v1173_v53, %v1175_v61  ;;  %v1279_v5 = vmul.f32 0.11111111, %v1247_v63 }
  0x86   : > { %1977 = vmatprep.mubr.msk.f32.mxu1 %vm456_vm2, %v1278_v62  ;;  %v1215_v6 = vsel %vm887_vm3, %v1212_v57, %v1214_v1  ;;  %v1248_v7 = vadd.f32 %v1213_v0, %v1209_v2 }
  0x87   : > { %v1210_v8 = vadd.f32 %v1176_v4, %v1168_v3  ;;  %1978 = vmatmul.mubr.msk.f32.gmra.mrb[28].mxu1 %vm456_vm2, %v1279_v5 }
  0x88   : > { %v1280_v9 = vmul.f32 0.11111111, %v1248_v7 }
  0x89   : > { %v1249_v10 = vadd.f32 %v1215_v6, %v1210_v8 }
  0x8a   : > { %1980 = vmatprep.mubr.msk.f32.mxu1 %vm456_vm2, %v1280_v9 }
  0x8b   : > { %v1281_v11 = vmul.f32 0.11111111, %v1249_v10 }
  0x8d   : > { %1981 = vmatmul.mubr.msk.f32.gmra.mrb[30].mxu1 %vm456_vm2, %v1281_v11 }
  0xec   : > { %v1887_v13 = vpop.f32.mrb[0].mxu0 }
  0xed   : > { %v597_v14 = vadd.f32 %v1887_v13, %v2265_v12  ;;  %v591_v15 = vpop.f32.mrb[1].mxu0 }
  0xee   : > { %v592_v16 = vadd.f32 %v2265_v12, %v591_v15 }
  0xef   : > { %752 = vst.msk [vmem:[%s2270_s12 + $0x8] sm:$0xff] %vm750_vm4, %v597_v14 }
  0xf0   : > { %751 = vst.msk [vmem:[%s2270_s12] sm:$0xff] %vm750_vm4, %v592_v16  ;;  %v1890_v18 = vpop.f32.mrb[2].mxu0 }
  0xf1   : > { %v607_v19 = vadd.f32 %v1890_v18, %v2265_v12  ;;  %v601_v20 = vpop.f32.mrb[3].mxu0 }
  0xf2   : > { %v602_v21 = vadd.f32 %v2265_v12, %v601_v20 }
  0xf3   : > { %754 = vst.msk [vmem:[%s2270_s12 + $0x18] sm:$0xff] %vm750_vm4, %v607_v19 }
  0xf4   : > { %753 = vst.msk [vmem:[%s2270_s12 + $0x10] sm:$0xff] %vm750_vm4, %v602_v21 }
  0xf8   : > { %v1893_v22 = vpop.f32.mrb[4].mxu0 }
  0xf9   : > { %v617_v23 = vadd.f32 %v1893_v22, %v2265_v12  ;;  %v611_v24 = vpop.f32.mrb[5].mxu0 }
  0xfa   : > { %v612_v25 = vadd.f32 %v2265_v12, %v611_v24 }
  0xfb   : > { %756 = vst.msk [vmem:[%s2270_s12 + $0x28] sm:$0xff] %vm750_vm4, %v617_v23 }
  0xfc   : > { %755 = vst.msk [vmem:[%s2270_s12 + $0x20] sm:$0xff] %vm750_vm4, %v612_v25 }
  0xfd   : > { %v1937_v17 = vpop.f32.mrb[0].mxu1 }
  0xfe   : > { %v1461_v27 = vadd.f32 %v1937_v17, %v2289_v26  ;;  %v1455_v28 = vpop.f32.mrb[1].mxu1 }
  0xff   : > { %v1456_v29 = vadd.f32 %v2289_v26, %v1455_v28 }
 0x100   : > { %1616 = vst.msk [vmem:[%s2298_s17 + $0x8] sm:$0xff] %vm1614_vm5, %v1461_v27  ;;  %v1896_v30 = vpop.f32.mrb[6].mxu0 }
 0x101   : > { %1615 = vst.msk [vmem:[%s2298_s17] sm:$0xff] %vm1614_vm5, %v1456_v29  ;;  %v627_v31 = vadd.f32 %v1896_v30, %v2265_v12  ;;  %v621_v32 = vpop.f32.mrb[7].mxu0 }
 0x102   : > { %v1940_v33 = vpop.f32.mrb[2].mxu1  ;;  %v622_v34 = vadd.f32 %v2265_v12, %v621_v32 }
 0x103   : > { %v1471_v35 = vadd.f32 %v1940_v33, %v2289_v26  ;;  %v1465_v36 = vpop.f32.mrb[3].mxu1  ;;  %758 = vst.msk [vmem:[%s2270_s12 + $0x38] sm:$0xff] %vm750_vm4, %v627_v31 }
 0x104   : > { %v1466_v37 = vadd.f32 %v2289_v26, %v1465_v36  ;;  %757 = vst.msk [vmem:[%s2270_s12 + $0x30] sm:$0xff] %vm750_vm4, %v622_v34 }
 0x105   : > { %1618 = vst.msk [vmem:[%s2298_s17 + $0x18] sm:$0xff] %vm1614_vm5, %v1471_v35 }
 0x106   : > { %1617 = vst.msk [vmem:[%s2298_s17 + $0x10] sm:$0xff] %vm1614_vm5, %v1466_v37 }
 0x107   : > { %v1943_v39 = vpop.f32.mrb[4].mxu1 }
 0x108   : > { %v1481_v40 = vadd.f32 %v1943_v39, %v2289_v26  ;;  %v1475_v41 = vpop.f32.mrb[5].mxu1  ;;  %v1899_v42 = vpop.f32.mrb[8].mxu0 }
 0x109   : > { %v1476_v43 = vadd.f32 %v2289_v26, %v1475_v41  ;;  %v637_v44 = vadd.f32 %v1899_v42, %v2265_v12  ;;  %v631_v45 = vpop.f32.mrb[9].mxu0 }
 0x10a   : > { %1620 = vst.msk [vmem:[%s2298_s17 + $0x28] sm:$0xff] %vm1614_vm5, %v1481_v40  ;;  %v632_v46 = vadd.f32 %v2265_v12, %v631_v45 }
 0x10b   : > { %1619 = vst.msk [vmem:[%s2298_s17 + $0x20] sm:$0xff] %vm1614_vm5, %v1476_v43 }
 0x10c   : > { %760 = vst.msk [vmem:[%s2270_s12 + $0x48] sm:$0xff] %vm750_vm4, %v637_v44  ;;  %759 = vst.msk [vmem:[%s2270_s12 + $0x40] sm:$0xff] %vm750_vm4, %v632_v46 }
 0x10e   : > { %v1946_v47 = vpop.f32.mrb[6].mxu1 }
 0x10f   : > { %v1491_v48 = vadd.f32 %v1946_v47, %v2289_v26  ;;  %v1485_v49 = vpop.f32.mrb[7].mxu1  ;;  %v1902_v50 = vpop.f32.mrb[10].mxu0 }
 0x110   : > { %v1486_v51 = vadd.f32 %v2289_v26, %v1485_v49  ;;  %v647_v38 = vadd.f32 %v1902_v50, %v2265_v12  ;;  %v641_v52 = vpop.f32.mrb[11].mxu0 }
 0x111   : > { %1622 = vst.msk [vmem:[%s2298_s17 + $0x38] sm:$0xff] %vm1614_vm5, %v1491_v48  ;;  %v642_v53 = vadd.f32 %v2265_v12, %v641_v52 }
 0x112   : > { %1621 = vst.msk [vmem:[%s2298_s17 + $0x30] sm:$0xff] %vm1614_vm5, %v1486_v51 }
 0x113   : > { %762 = vst.msk [vmem:[%s2270_s12 + $0x58] sm:$0xff] %vm750_vm4, %v647_v38  ;;  %761 = vst.msk [vmem:[%s2270_s12 + $0x50] sm:$0xff] %vm750_vm4, %v642_v53 }
 0x115   : > { %v1949_v54 = vpop.f32.mrb[8].mxu1 }
 0x116   : > { %v1501_v55 = vadd.f32 %v1949_v54, %v2289_v26  ;;  %v1495_v56 = vpop.f32.mrb[9].mxu1  ;;  %v1905_v57 = vpop.f32.mrb[12].mxu0 }
 0x117   : > { %v1496_v58 = vadd.f32 %v2289_v26, %v1495_v56  ;;  %v657_v59 = vadd.f32 %v1905_v57, %v2265_v12  ;;  %v651_v60 = vpop.f32.mrb[13].mxu0 }
 0x118   : > { %1624 = vst.msk [vmem:[%s2298_s17 + $0x48] sm:$0xff] %vm1614_vm5, %v1501_v55  ;;  %v652_v61 = vadd.f32 %v2265_v12, %v651_v60 }
 0x119   : > { %1623 = vst.msk [vmem:[%s2298_s17 + $0x40] sm:$0xff] %vm1614_vm5, %v1496_v58 }
 0x11a   : > { %764 = vst.msk [vmem:[%s2270_s12 + $0x68] sm:$0xff] %vm750_vm4, %v657_v59  ;;  %763 = vst.msk [vmem:[%s2270_s12 + $0x60] sm:$0xff] %vm750_vm4, %v652_v61 }
 0x11c   : > { %v1952_v62 = vpop.f32.mrb[10].mxu1 }
 0x11d   : > { %v1511_v63 = vadd.f32 %v1952_v62, %v2289_v26  ;;  %v1505_v0 = vpop.f32.mrb[11].mxu1  ;;  %v1908_v1 = vpop.f32.mrb[14].mxu0 }
 0x11e   : > { %v1506_v2 = vadd.f32 %v2289_v26, %v1505_v0  ;;  %v667_v3 = vadd.f32 %v1908_v1, %v2265_v12  ;;  %v661_v4 = vpop.f32.mrb[15].mxu0 }
 0x11f   : > { %1626 = vst.msk [vmem:[%s2298_s17 + $0x58] sm:$0xff] %vm1614_vm5, %v1511_v63  ;;  %v662_v5 = vadd.f32 %v2265_v12, %v661_v4 }
 0x120   : > { %1625 = vst.msk [vmem:[%s2298_s17 + $0x50] sm:$0xff] %vm1614_vm5, %v1506_v2 }
 0x121   : > { %766 = vst.msk [vmem:[%s2270_s12 + $0x78] sm:$0xff] %vm750_vm4, %v667_v3  ;;  %765 = vst.msk [vmem:[%s2270_s12 + $0x70] sm:$0xff] %vm750_vm4, %v662_v5 }
 0x123   : > { %v1955_v6 = vpop.f32.mrb[12].mxu1 }
 0x124   : > { %v1521_v7 = vadd.f32 %v1955_v6, %v2289_v26  ;;  %v1515_v8 = vpop.f32.mrb[13].mxu1  ;;  %v1911_v9 = vpop.f32.mrb[16].mxu0 }
 0x125   : > { %v1516_v10 = vadd.f32 %v2289_v26, %v1515_v8  ;;  %v677_v11 = vadd.f32 %v1911_v9, %v2265_v12  ;;  %v671_v13 = vpop.f32.mrb[17].mxu0 }
 0x126   : > { %1628 = vst.msk [vmem:[%s2298_s17 + $0x68] sm:$0xff] %vm1614_vm5, %v1521_v7  ;;  %v672_v14 = vadd.f32 %v2265_v12, %v671_v13 }
 0x127   : > { %1627 = vst.msk [vmem:[%s2298_s17 + $0x60] sm:$0xff] %vm1614_vm5, %v1516_v10 }
 0x128   : > { %768 = vst.msk [vmem:[%s2270_s12 + $0x88] sm:$0xff] %vm750_vm4, %v677_v11  ;;  %767 = vst.msk [vmem:[%s2270_s12 + $0x80] sm:$0xff] %vm750_vm4, %v672_v14 }
 0x12a   : > { %v1958_v15 = vpop.f32.mrb[14].mxu1 }
 0x12b   : > { %v1531_v16 = vadd.f32 %v1958_v15, %v2289_v26  ;;  %v1525_v18 = vpop.f32.mrb[15].mxu1  ;;  %v1914_v19 = vpop.f32.mrb[18].mxu0 }
 0x12c   : > { %v1526_v20 = vadd.f32 %v2289_v26, %v1525_v18  ;;  %v687_v21 = vadd.f32 %v1914_v19, %v2265_v12  ;;  %v681_v22 = vpop.f32.mrb[19].mxu0 }
 0x12d   : > { %1630 = vst.msk [vmem:[%s2298_s17 + $0x78] sm:$0xff] %vm1614_vm5, %v1531_v16  ;;  %v682_v23 = vadd.f32 %v2265_v12, %v681_v22 }
 0x12e   : > { %1629 = vst.msk [vmem:[%s2298_s17 + $0x70] sm:$0xff] %vm1614_vm5, %v1526_v20 }
 0x12f   : > { %770 = vst.msk [vmem:[%s2270_s12 + $0x98] sm:$0xff] %vm750_vm4, %v687_v21  ;;  %769 = vst.msk [vmem:[%s2270_s12 + $0x90] sm:$0xff] %vm750_vm4, %v682_v23 }
 0x131   : > { %v1961_v24 = vpop.f32.mrb[16].mxu1 }
 0x132   : > { %v1541_v25 = vadd.f32 %v1961_v24, %v2289_v26  ;;  %v1535_v17 = vpop.f32.mrb[17].mxu1  ;;  %v1917_v27 = vpop.f32.mrb[20].mxu0 }
 0x133   : > { %v1536_v28 = vadd.f32 %v2289_v26, %v1535_v17  ;;  %v697_v29 = vadd.f32 %v1917_v27, %v2265_v12  ;;  %v691_v30 = vpop.f32.mrb[21].mxu0 }
 0x134   : > { %1632 = vst.msk [vmem:[%s2298_s17 + $0x88] sm:$0xff] %vm1614_vm5, %v1541_v25  ;;  %v692_v31 = vadd.f32 %v2265_v12, %v691_v30 }
 0x135   : > { %1631 = vst.msk [vmem:[%s2298_s17 + $0x80] sm:$0xff] %vm1614_vm5, %v1536_v28 }
 0x136   : > { %772 = vst.msk [vmem:[%s2270_s12 + $0xa8] sm:$0xff] %vm750_vm4, %v697_v29  ;;  %771 = vst.msk [vmem:[%s2270_s12 + $0xa0] sm:$0xff] %vm750_vm4, %v692_v31 }
 0x138   : > { %v1964_v32 = vpop.f32.mrb[18].mxu1 }
 0x139   : > { %v1551_v33 = vadd.f32 %v1964_v32, %v2289_v26  ;;  %v1545_v34 = vpop.f32.mrb[19].mxu1  ;;  %v1920_v35 = vpop.f32.mrb[22].mxu0 }
 0x13a   : > { %v1546_v36 = vadd.f32 %v2289_v26, %v1545_v34  ;;  %v707_v37 = vadd.f32 %v1920_v35, %v2265_v12  ;;  %v701_v39 = vpop.f32.mrb[23].mxu0 }
 0x13b   : > { %1634 = vst.msk [vmem:[%s2298_s17 + $0x98] sm:$0xff] %vm1614_vm5, %v1551_v33  ;;  %v702_v40 = vadd.f32 %v2265_v12, %v701_v39 }
 0x13c   : > { %1633 = vst.msk [vmem:[%s2298_s17 + $0x90] sm:$0xff] %vm1614_vm5, %v1546_v36 }
 0x13d   : > { %774 = vst.msk [vmem:[%s2270_s12 + $0xb8] sm:$0xff] %vm750_vm4, %v707_v37  ;;  %773 = vst.msk [vmem:[%s2270_s12 + $0xb0] sm:$0xff] %vm750_vm4, %v702_v40 }
 0x13f   : > { %v1967_v41 = vpop.f32.mrb[20].mxu1 }
 0x140   : > { %v1561_v42 = vadd.f32 %v1967_v41, %v2289_v26  ;;  %v1555_v43 = vpop.f32.mrb[21].mxu1  ;;  %v1923_v44 = vpop.f32.mrb[24].mxu0 }
 0x141   : > { %v1556_v45 = vadd.f32 %v2289_v26, %v1555_v43  ;;  %v717_v46 = vadd.f32 %v1923_v44, %v2265_v12  ;;  %v711_v47 = vpop.f32.mrb[25].mxu0 }
 0x142   : > { %1636 = vst.msk [vmem:[%s2298_s17 + $0xa8] sm:$0xff] %vm1614_vm5, %v1561_v42  ;;  %v712_v48 = vadd.f32 %v2265_v12, %v711_v47 }
 0x143   : > { %1635 = vst.msk [vmem:[%s2298_s17 + $0xa0] sm:$0xff] %vm1614_vm5, %v1556_v45 }
 0x144   : > { %776 = vst.msk [vmem:[%s2270_s12 + $0xc8] sm:$0xff] %vm750_vm4, %v717_v46  ;;  %775 = vst.msk [vmem:[%s2270_s12 + $0xc0] sm:$0xff] %vm750_vm4, %v712_v48 }
 0x146   : > { %v1970_v49 = vpop.f32.mrb[22].mxu1 }
 0x147   : > { %v1571_v50 = vadd.f32 %v1970_v49, %v2289_v26  ;;  %v1565_v51 = vpop.f32.mrb[23].mxu1  ;;  %v1926_v38 = vpop.f32.mrb[26].mxu0 }
 0x148   : > { %v1566_v52 = vadd.f32 %v2289_v26, %v1565_v51  ;;  %v727_v53 = vadd.f32 %v1926_v38, %v2265_v12  ;;  %v721_v54 = vpop.f32.mrb[27].mxu0 }
 0x149   : > { %1638 = vst.msk [vmem:[%s2298_s17 + $0xb8] sm:$0xff] %vm1614_vm5, %v1571_v50  ;;  %v722_v55 = vadd.f32 %v2265_v12, %v721_v54 }
 0x14a   : > { %1637 = vst.msk [vmem:[%s2298_s17 + $0xb0] sm:$0xff] %vm1614_vm5, %v1566_v52 }
 0x14b   : > { %778 = vst.msk [vmem:[%s2270_s12 + $0xd8] sm:$0xff] %vm750_vm4, %v727_v53  ;;  %777 = vst.msk [vmem:[%s2270_s12 + $0xd0] sm:$0xff] %vm750_vm4, %v722_v55 }
 0x14d   : > { %v1973_v56 = vpop.f32.mrb[24].mxu1 }
 0x14e   : > { %v1581_v57 = vadd.f32 %v1973_v56, %v2289_v26  ;;  %v1575_v58 = vpop.f32.mrb[25].mxu1  ;;  %v1929_v59 = vpop.f32.mrb[28].mxu0 }
 0x14f   : > { %v1576_v60 = vadd.f32 %v2289_v26, %v1575_v58  ;;  %v737_v61 = vadd.f32 %v1929_v59, %v2265_v12  ;;  %v731_v62 = vpop.f32.mrb[29].mxu0 }
 0x150   : > { %1640 = vst.msk [vmem:[%s2298_s17 + $0xc8] sm:$0xff] %vm1614_vm5, %v1581_v57  ;;  %v732_v63 = vadd.f32 %v2265_v12, %v731_v62 }
 0x151   : > { %1639 = vst.msk [vmem:[%s2298_s17 + $0xc0] sm:$0xff] %vm1614_vm5, %v1576_v60 }
 0x152   : > { %780 = vst.msk [vmem:[%s2270_s12 + $0xe8] sm:$0xff] %vm750_vm4, %v737_v61  ;;  %779 = vst.msk [vmem:[%s2270_s12 + $0xe0] sm:$0xff] %vm750_vm4, %v732_v63 }
 0x154   : > { %v1976_v0 = vpop.f32.mrb[26].mxu1  ;;  %v1932_v1 = vpop.f32.mrb[30].mxu0 }
 0x155   : > { %v1591_v2 = vadd.f32 %v1976_v0, %v2289_v26  ;;  %v1585_v3 = vpop.f32.mrb[27].mxu1  ;;  %v747_v4 = vadd.f32 %v1932_v1, %v2265_v12  ;;  %v741_v5 = vpop.f32.mrb[31].mxu0 }
 0x156   : > { %v1586_v6 = vadd.f32 %v2289_v26, %v1585_v3  ;;  %v742_v7 = vadd.f32 %v2265_v12, %v741_v5 }
 0x157   : > { %1642 = vst.msk [vmem:[%s2298_s17 + $0xd8] sm:$0xff] %vm1614_vm5, %v1591_v2 }
 0x158   : > { %782 = vst.msk [vmem:[%s2270_s12 + $0xf8] sm:$0xff] %vm750_vm4, %v747_v4  ;;  %781 = vst.msk [vmem:[%s2270_s12 + $0xf0] sm:$0xff] %vm750_vm4, %v742_v7 }
 0x159   : > { %1641 = vst.msk [vmem:[%s2298_s17 + $0xd0] sm:$0xff] %vm1614_vm5, %v1586_v6 }
 0x15a   : > { %v1979_v8 = vpop.f32.mrb[28].mxu1 }
 0x15b   : > { %v1601_v9 = vadd.f32 %v1979_v8, %v2289_v26  ;;  %v1595_v10 = vpop.f32.mrb[29].mxu1 }
 0x15c   : > { %v1596_v11 = vadd.f32 %v2289_v26, %v1595_v10 }
 0x15d   : > { %1644 = vst.msk [vmem:[%s2298_s17 + $0xe8] sm:$0xff] %vm1614_vm5, %v1601_v9 }
 0x15e   : > { %1643 = vst.msk [vmem:[%s2298_s17 + $0xe0] sm:$0xff] %vm1614_vm5, %v1596_v11 }
 0x160   : > { %v1982_v12 = vpop.f32.mrb[30].mxu1 }
 0x161   : > { %v1611_v13 = vadd.f32 %v1982_v12, %v2289_v26  ;;  %v1605_v14 = vpop.f32.mrb[31].mxu1 }
 0x162   : > { %v1606_v15 = vadd.f32 %v2289_v26, %v1605_v14 }
 0x163   : > { %1646 = vst.msk [vmem:[%s2298_s17 + $0xf8] sm:$0xff] %vm1614_vm5, %v1611_v13 }
 0x164   : > { %1645 = vst.msk [vmem:[%s2298_s17 + $0xf0] sm:$0xff] %vm1614_vm5, %v1606_v15 }
 0x165 PF: > { %s17_s21 = sadd.s32 1, %s1998_s21  }
 0x166   : > { %p14_p4 = scmp.ge.s32.totalorder %s17_s21, 4  }
 0x168   :  { %16 = sbr.rel (!%p14_p4) target bundleno = 1 (0x1), region = 82 }

</bundles_post_ra>
